<compile_context>
chip_gen: v5e
topology: v5e:2x2
jax: 0.10.0
libtpu: 0.0.40
codegen_flags: <defaults>
</compile_context>

<pallas_src>
import math
import functools

import jax
import jax.numpy as jnp
from jax import lax
from jax.experimental import pallas as pl
from jax.experimental.pallas import tpu as pltpu


# ----------------------------------------------------------------------------
# Fused kernel: projection + PE + all encoder layers for one batch element
# ----------------------------------------------------------------------------

def fused_encoder_kernel(x_ref,            # (1, S, Din)
                         w_in_ref,         # (Din, D)   pre-transposed
                         bias_pe_ref,      # (S, D)     b_in + positional enc.
                         wqkv_ref,         # (L, D, 3D) pre-transposed in_proj
                         bqkv_ref,         # (L, 1, 3D)
                         wo_ref,           # (L, D, D)  pre-transposed out_proj
                         bo_ref,           # (L, 1, D)
                         w1_ref,           # (L, D, F)  pre-transposed linear1
                         b1_ref,           # (L, 1, F)
                         w2_ref,           # (L, F, D)  pre-transposed linear2
                         b2_ref,           # (L, 1, D)
                         g1_ref, be1_ref,  # (L, 1, D)  LayerNorm1
                         g2_ref, be2_ref,  # (L, 1, D)  LayerNorm2
                         o_ref,            # (1, S, D)
                         *, nhead, num_layers, eps=1e-5):
    x = x_ref[0]                                                  # (S, Din)

    # input projection + (bias + positional encoding) folded into one add
    x = jnp.dot(x, w_in_ref[...],
                preferred_element_type=jnp.float32) + bias_pe_ref[...]   # (S, D)

    S, D = x.shape
    dk = D // nhead
    scale = 1.0 / math.sqrt(dk)

    def layer_norm(y, g, b):
        mu = jnp.mean(y, axis=-1, keepdims=True)
        var = jnp.mean((y - mu) ** 2, axis=-1, keepdims=True)
        return (y - mu) * lax.rsqrt(var + eps) * g + b

    def split_heads(t):                                            # (S, D) -> (H, S, dk)
        return jnp.stack([t[:, h * dk:(h + 1) * dk] for h in range(nhead)], axis=0)

    # static unroll over layers (num_layers is small and known at trace time)
    for li in range(num_layers):
        # ---- multi-head self-attention --------------------------------
        qkv = jnp.dot(x, wqkv_ref[li],
                      preferred_element_type=jnp.float32) + bqkv_ref[li]  # (S, 3D)
        q = qkv[:, 0 * D:1 * D] * scale           # fold 1/sqrt(dk) into q
        k = qkv[:, 1 * D:2 * D]
        v = qkv[:, 2 * D:3 * D]

        q3, k3, v3 = split_heads(q), split_heads(k), split_heads(v)   # (H, S, dk)

        s = jnp.einsum('hqd,hkd->hqk', q3, k3,
                       preferred_element_type=jnp.float32)            # (H, S, S)
        s = s - jnp.max(s, axis=-1, keepdims=True)
        p = jnp.exp(s)
        p = p * pl.reciprocal(jnp.sum(p, axis=-1, keepdims=True), approx=True)

        ctx = jnp.einsum('hqk,hkd->hqd', p, v3,
                         preferred_element_type=jnp.float32)           # (H, S, dk)
        ctx = jnp.concatenate([ctx[h] for h in range(nhead)], axis=-1)  # (S, D)

        attn = jnp.dot(ctx, wo_ref[li],
                       preferred_element_type=jnp.float32) + bo_ref[li]

        # TODO(synk): dropout layers are identity here (eval-mode semantics).
        x = layer_norm(x + attn, g1_ref[li], be1_ref[li])

        # ---- feed-forward ----------------------------------------------
        ff = jnp.dot(x, w1_ref[li],
                     preferred_element_type=jnp.float32) + b1_ref[li]
        ff = jnp.maximum(ff, 0.0)                                      # ReLU
        ff = jnp.dot(ff, w2_ref[li],
                     preferred_element_type=jnp.float32) + b2_ref[li]

        x = layer_norm(x + ff, g2_ref[li], be2_ref[li])

    o_ref[0] = x


# ----------------------------------------------------------------------------
# Wrapper (single pallas_call for the whole model)
# ----------------------------------------------------------------------------

def _full_spec(arr):
    nd = arr.ndim
    return pl.BlockSpec(arr.shape, lambda b, _n=nd: (0,) * _n)


def sinusoidal_pe(seq_len, d_model):
    pos = jnp.arange(seq_len, dtype=jnp.float32)[:, None]                 # (S, 1)
    div = jnp.exp(jnp.arange(0, d_model, 2, dtype=jnp.float32)
                  * (-math.log(10000.0) / d_model))                       # (D/2,)
    ang = pos * div                                                       # (S, D/2)
    pe = jnp.zeros((seq_len, d_model), jnp.float32)
    pe = pe.at[:, 0::2].set(jnp.sin(ang))
    pe = pe.at[:, 1::2].set(jnp.cos(ang))
    return pe


def transformer_encoder_forward(src_sbd, params, nhead):
    """src_sbd: [seq_len, batch, input_dim] -> [seq_len, batch, d_model]."""
    (w_in_t, b_in), stacked = params
    S, B, Din = src_sbd.shape
    D = w_in_t.shape[1]
    L = stacked[0].shape[0]

    # fold input-projection bias and positional encoding into one (S, D) bias
    bias_pe = sinusoidal_pe(S, D) + b_in                     # (S, D)

    x = jnp.transpose(src_sbd, (1, 0, 2))                    # (B, S, Din)

    kernel = functools.partial(fused_encoder_kernel, nhead=nhead, num_layers=L)
    out = pl.pallas_call(
        kernel,
        out_shape=jax.ShapeDtypeStruct((B, S, D), jnp.float32),
        grid=(B,),
        in_specs=[pl.BlockSpec((1, S, Din), lambda b: (b, 0, 0)),
                  _full_spec(w_in_t), _full_spec(bias_pe)]
                 + [_full_spec(p) for p in stacked],
        out_specs=pl.BlockSpec((1, S, D), lambda b: (b, 0, 0)),
        compiler_params=pltpu.CompilerParams(dimension_semantics=("parallel",)),
    )(x, w_in_t, bias_pe, *stacked)

    return jnp.transpose(out, (1, 0, 2))                     # (S, B, D)


# ----------------------------------------------------------------------------
# Parameter construction (deterministic, synthetic; weights pre-transposed)
# ----------------------------------------------------------------------------

def init_params(key, input_dim, d_model, nhead, num_layers, dim_feedforward):
    def nrm(k, shape, scale=0.05):
        return (scale * jax.random.normal(k, shape)).astype(jnp.float32)

    keys = jax.random.split(key, 2 + num_layers)
    # stored pre-transposed so every in-kernel matmul is x @ w (no .T in kernel)
    w_in_t = nrm(keys[0], (input_dim, d_model))     # = W_in^T
    b_in = nrm(keys[1], (1, d_model))

    per_layer = []
    for li in range(num_layers):
        lk = jax.random.split(keys[2 + li], 8)
        wqkv_t = nrm(lk[0], (d_model, 3 * d_model))           # = W_qkv^T
        bqkv = nrm(lk[1], (1, 3 * d_model))
        wo_t = nrm(lk[2], (d_model, d_model))                 # = W_o^T
        bo = nrm(lk[3], (1, d_model))
        w1_t = nrm(lk[4], (d_model, dim_feedforward))         # = W_1^T
        b1 = nrm(lk[5], (1, dim_feedforward))
        w2_t = nrm(lk[6], (dim_feedforward, d_model))         # = W_2^T
        b2 = nrm(lk[7], (1, d_model))
        g1 = jnp.ones((1, d_model), jnp.float32)
        be1 = jnp.zeros((1, d_model), jnp.float32)
        g2 = jnp.ones((1, d_model), jnp.float32)
        be2 = jnp.zeros((1, d_model), jnp.float32)
        per_layer.append((wqkv_t, bqkv, wo_t, bo, w1_t, b1, w2_t, b2,
                          g1, be1, g2, be2))

    # stack per-layer params with a leading layer axis -> one fused pallas_call
    stacked = tuple(jnp.stack(ps, axis=0) for ps in zip(*per_layer))
    return (w_in_t, b_in), stacked


# ----------------------------------------------------------------------------
# Main
# ----------------------------------------------------------------------------

if __name__ == "__main__":
    # small shapes consistent with the module's forward contract
    SEQ, BATCH, INPUT_DIM = 8, 2, 16
    D_MODEL, NHEAD, NUM_LAYERS, FFN = 32, 4, 2, 64

    key = jax.random.PRNGKey(0)
    k_src, k_par = jax.random.split(key)

    src = jax.random.normal(k_src, (SEQ, BATCH, INPUT_DIM), jnp.float32)
    params = init_params(k_par, INPUT_DIM, D_MODEL, NHEAD, NUM_LAYERS, FFN)

    out = transformer_encoder_forward(src, params, NHEAD)
    out = jax.block_until_ready(out)

    assert out.shape == (SEQ, BATCH, D_MODEL), out.shape
    assert bool(jnp.all(jnp.isfinite(out)))
    print("KERNEL_OK")
</pallas_src>

<mosaic_0001>
module attributes {stable_mosaic.version = 11 : i64} {
  func.func @fused_encoder_kernel(%arg0: i32, %arg1: memref<1x8x16xf32, #tpu.memory_space<vmem>>, %arg2: memref<16x32xf32, #tpu.memory_space<vmem>>, %arg3: memref<8x32xf32, #tpu.memory_space<vmem>>, %arg4: memref<2x32x96xf32, #tpu.memory_space<vmem>>, %arg5: memref<2x1x96xf32, #tpu.memory_space<vmem>>, %arg6: memref<2x32x32xf32, #tpu.memory_space<vmem>>, %arg7: memref<2x1x32xf32, #tpu.memory_space<vmem>>, %arg8: memref<2x32x64xf32, #tpu.memory_space<vmem>>, %arg9: memref<2x1x64xf32, #tpu.memory_space<vmem>>, %arg10: memref<2x64x32xf32, #tpu.memory_space<vmem>>, %arg11: memref<2x1x32xf32, #tpu.memory_space<vmem>>, %arg12: memref<2x1x32xf32, #tpu.memory_space<vmem>>, %arg13: memref<2x1x32xf32, #tpu.memory_space<vmem>>, %arg14: memref<2x1x32xf32, #tpu.memory_space<vmem>>, %arg15: memref<2x1x32xf32, #tpu.memory_space<vmem>>, %arg16: memref<1x8x32xf32, #tpu.memory_space<vmem>>) attributes {dimension_semantics = [#tpu.dimension_semantics<parallel>], iteration_bounds = array<i64: 2>, scalar_prefetch = 0 : i64, scratch_operands = 0 : i64, tpu.core_type = #tpu.core_type<tc>, window_params = [{transform_indices = @transform_0, window_bounds = array<i64: 1, 8, 16>}, {pipeline_mode = #tpu.pipeline_mode<synchronous>, transform_indices = @transform_1, window_bounds = array<i64: 16, 32>}, {pipeline_mode = #tpu.pipeline_mode<synchronous>, transform_indices = @transform_2, window_bounds = array<i64: 8, 32>}, {pipeline_mode = #tpu.pipeline_mode<synchronous>, transform_indices = @transform_3, window_bounds = array<i64: 2, 32, 96>}, {pipeline_mode = #tpu.pipeline_mode<synchronous>, transform_indices = @transform_4, window_bounds = array<i64: 2, 1, 96>}, {pipeline_mode = #tpu.pipeline_mode<synchronous>, transform_indices = @transform_5, window_bounds = array<i64: 2, 32, 32>}, {pipeline_mode = #tpu.pipeline_mode<synchronous>, transform_indices = @transform_6, window_bounds = array<i64: 2, 1, 32>}, {pipeline_mode = #tpu.pipeline_mode<synchronous>, transform_indices = @transform_7, window_bounds = array<i64: 2, 32, 64>}, {pipeline_mode = #tpu.pipeline_mode<synchronous>, transform_indices = @transform_8, window_bounds = array<i64: 2, 1, 64>}, {pipeline_mode = #tpu.pipeline_mode<synchronous>, transform_indices = @transform_9, window_bounds = array<i64: 2, 64, 32>}, {pipeline_mode = #tpu.pipeline_mode<synchronous>, transform_indices = @transform_10, window_bounds = array<i64: 2, 1, 32>}, {pipeline_mode = #tpu.pipeline_mode<synchronous>, transform_indices = @transform_11, window_bounds = array<i64: 2, 1, 32>}, {pipeline_mode = #tpu.pipeline_mode<synchronous>, transform_indices = @transform_12, window_bounds = array<i64: 2, 1, 32>}, {pipeline_mode = #tpu.pipeline_mode<synchronous>, transform_indices = @transform_13, window_bounds = array<i64: 2, 1, 32>}, {pipeline_mode = #tpu.pipeline_mode<synchronous>, transform_indices = @transform_14, window_bounds = array<i64: 2, 1, 32>}, {transform_indices = @transform_15, window_bounds = array<i64: 1, 8, 32>}]} {
    %c0 = arith.constant 0 : index
    %c0_0 = arith.constant 0 : index
    %c0_1 = arith.constant 0 : index
    %0 = vector.load %arg1[%c0, %c0_0, %c0_1] : memref<1x8x16xf32, #tpu.memory_space<vmem>>, vector<1x8x16xf32>
    %1 = vector.shape_cast %0 : vector<1x8x16xf32> to vector<8x16xf32>
    %c0_2 = arith.constant 0 : index
    %c0_3 = arith.constant 0 : index
    %2 = vector.load %arg2[%c0_2, %c0_3] : memref<16x32xf32, #tpu.memory_space<vmem>>, vector<16x32xf32>
    %cst = arith.constant dense<0.000000e+00> : vector<8x32xf32>
    %3 = tpu.matmul %1, %2, %cst {dimension_numbers = #tpu.dot_dimension_numbers<[1], [0], [0], [1], [0, 0, 1, 1], [], []>} : vector<8x16xf32>, vector<16x32xf32>, vector<8x32xf32> -> vector<8x32xf32>
    %c0_4 = arith.constant 0 : index
    %c0_5 = arith.constant 0 : index
    %4 = vector.load %arg3[%c0_4, %c0_5] : memref<8x32xf32, #tpu.memory_space<vmem>>, vector<8x32xf32>
    %5 = arith.addf %3, %4 : vector<8x32xf32>
    %c0_6 = arith.constant 0 : index
    %c0_7 = arith.constant 0 : index
    %c0_8 = arith.constant 0 : index
    %6 = vector.load %arg4[%c0_6, %c0_7, %c0_8] : memref<2x32x96xf32, #tpu.memory_space<vmem>>, vector<1x32x96xf32>
    %7 = vector.shape_cast %6 : vector<1x32x96xf32> to vector<32x96xf32>
    %cst_9 = arith.constant dense<0.000000e+00> : vector<8x96xf32>
    %8 = tpu.matmul %5, %7, %cst_9 {dimension_numbers = #tpu.dot_dimension_numbers<[1], [0], [0], [1], [0, 0, 1, 1], [], []>} : vector<8x32xf32>, vector<32x96xf32>, vector<8x96xf32> -> vector<8x96xf32>
    %c0_10 = arith.constant 0 : index
    %c0_11 = arith.constant 0 : index
    %c0_12 = arith.constant 0 : index
    %9 = vector.load %arg5[%c0_10, %c0_11, %c0_12] : memref<2x1x96xf32, #tpu.memory_space<vmem>>, vector<1x1x96xf32>
    %10 = vector.shape_cast %9 : vector<1x1x96xf32> to vector<1x96xf32>
    %11 = vector.broadcast %10 : vector<1x96xf32> to vector<8x96xf32>
    %12 = arith.addf %8, %11 : vector<8x96xf32>
    %13 = vector.extract_strided_slice %12 {offsets = [0, 0], sizes = [8, 32], strides = [1, 1]} : vector<8x96xf32> to vector<8x32xf32>
    %cst_13 = arith.constant 0.353553385 : f32
    %14 = vector.broadcast %cst_13 : f32 to vector<8x32xf32>
    %15 = arith.mulf %13, %14 : vector<8x32xf32>
    %16 = vector.extract_strided_slice %12 {offsets = [0, 32], sizes = [8, 32], strides = [1, 1]} : vector<8x96xf32> to vector<8x32xf32>
    %17 = vector.extract_strided_slice %12 {offsets = [0, 64], sizes = [8, 32], strides = [1, 1]} : vector<8x96xf32> to vector<8x32xf32>
    %18 = vector.extract_strided_slice %15 {offsets = [0, 0], sizes = [8, 8], strides = [1, 1]} : vector<8x32xf32> to vector<8x8xf32>
    %19 = vector.extract_strided_slice %15 {offsets = [0, 8], sizes = [8, 8], strides = [1, 1]} : vector<8x32xf32> to vector<8x8xf32>
    %20 = vector.extract_strided_slice %15 {offsets = [0, 16], sizes = [8, 8], strides = [1, 1]} : vector<8x32xf32> to vector<8x8xf32>
    %21 = vector.extract_strided_slice %15 {offsets = [0, 24], sizes = [8, 8], strides = [1, 1]} : vector<8x32xf32> to vector<8x8xf32>
    %22 = vector.shape_cast %18 : vector<8x8xf32> to vector<1x8x8xf32>
    %23 = vector.shape_cast %19 : vector<8x8xf32> to vector<1x8x8xf32>
    %24 = vector.shape_cast %20 : vector<8x8xf32> to vector<1x8x8xf32>
    %25 = vector.shape_cast %21 : vector<8x8xf32> to vector<1x8x8xf32>
    %26 = tpu.concatenate %22, %23, %24, %25 in 0 : vector<1x8x8xf32>, vector<1x8x8xf32>, vector<1x8x8xf32>, vector<1x8x8xf32> -> vector<4x8x8xf32>
    %27 = vector.extract_strided_slice %16 {offsets = [0, 0], sizes = [8, 8], strides = [1, 1]} : vector<8x32xf32> to vector<8x8xf32>
    %28 = vector.extract_strided_slice %16 {offsets = [0, 8], sizes = [8, 8], strides = [1, 1]} : vector<8x32xf32> to vector<8x8xf32>
    %29 = vector.extract_strided_slice %16 {offsets = [0, 16], sizes = [8, 8], strides = [1, 1]} : vector<8x32xf32> to vector<8x8xf32>
    %30 = vector.extract_strided_slice %16 {offsets = [0, 24], sizes = [8, 8], strides = [1, 1]} : vector<8x32xf32> to vector<8x8xf32>
    %31 = vector.shape_cast %27 : vector<8x8xf32> to vector<1x8x8xf32>
    %32 = vector.shape_cast %28 : vector<8x8xf32> to vector<1x8x8xf32>
    %33 = vector.shape_cast %29 : vector<8x8xf32> to vector<1x8x8xf32>
    %34 = vector.shape_cast %30 : vector<8x8xf32> to vector<1x8x8xf32>
    %35 = tpu.concatenate %31, %32, %33, %34 in 0 : vector<1x8x8xf32>, vector<1x8x8xf32>, vector<1x8x8xf32>, vector<1x8x8xf32> -> vector<4x8x8xf32>
    %36 = vector.extract_strided_slice %17 {offsets = [0, 0], sizes = [8, 8], strides = [1, 1]} : vector<8x32xf32> to vector<8x8xf32>
    %37 = vector.extract_strided_slice %17 {offsets = [0, 8], sizes = [8, 8], strides = [1, 1]} : vector<8x32xf32> to vector<8x8xf32>
    %38 = vector.extract_strided_slice %17 {offsets = [0, 16], sizes = [8, 8], strides = [1, 1]} : vector<8x32xf32> to vector<8x8xf32>
    %39 = vector.extract_strided_slice %17 {offsets = [0, 24], sizes = [8, 8], strides = [1, 1]} : vector<8x32xf32> to vector<8x8xf32>
    %40 = vector.shape_cast %36 : vector<8x8xf32> to vector<1x8x8xf32>
    %41 = vector.shape_cast %37 : vector<8x8xf32> to vector<1x8x8xf32>
    %42 = vector.shape_cast %38 : vector<8x8xf32> to vector<1x8x8xf32>
    %43 = vector.shape_cast %39 : vector<8x8xf32> to vector<1x8x8xf32>
    %44 = tpu.concatenate %40, %41, %42, %43 in 0 : vector<1x8x8xf32>, vector<1x8x8xf32>, vector<1x8x8xf32>, vector<1x8x8xf32> -> vector<4x8x8xf32>
    "tpu.trace_start"() <{level = 10 : i32, message = "hqd,hkd->hqk"}> : () -> ()
    %cst_14 = arith.constant dense<0.000000e+00> : vector<4x8x8xf32>
    %45 = tpu.matmul %26, %35, %cst_14 {dimension_numbers = #tpu.dot_dimension_numbers<[2], [2], [1], [1], [0, 0, 0, 1, 1, 1], [0], [0]>} : vector<4x8x8xf32>, vector<4x8x8xf32>, vector<4x8x8xf32> -> vector<4x8x8xf32>
    "tpu.trace_stop"() : () -> ()
    %cst_15 = arith.constant dense<0xFF800000> : vector<4x8xf32>
    %46 = vector.multi_reduction <maximumf>, %45, %cst_15 [2] : vector<4x8x8xf32> to vector<4x8xf32>
    %47 = vector.shape_cast %46 : vector<4x8xf32> to vector<4x8x1xf32>
    %48 = vector.broadcast %47 : vector<4x8x1xf32> to vector<4x8x8xf32>
    %49 = arith.subf %45, %48 : vector<4x8x8xf32>
    %50 = math.exp %49 : vector<4x8x8xf32>
    %cst_16 = arith.constant dense<0.000000e+00> : vector<4x8xf32>
    %51 = vector.multi_reduction <add>, %50, %cst_16 [2] : vector<4x8x8xf32> to vector<4x8xf32>
    %52 = vector.shape_cast %51 : vector<4x8xf32> to vector<4x8x1xf32>
    %53 = tpu.reciprocal %52 {approx = true} : vector<4x8x1xf32> -> vector<4x8x1xf32>
    %54 = vector.broadcast %53 : vector<4x8x1xf32> to vector<4x8x8xf32>
    %55 = arith.mulf %50, %54 : vector<4x8x8xf32>
    "tpu.trace_start"() <{level = 10 : i32, message = "hqk,hkd->hqd"}> : () -> ()
    %cst_17 = arith.constant dense<0.000000e+00> : vector<4x8x8xf32>
    %56 = tpu.matmul %55, %44, %cst_17 {dimension_numbers = #tpu.dot_dimension_numbers<[2], [1], [1], [2], [0, 0, 0, 1, 1, 2], [0], [0]>} : vector<4x8x8xf32>, vector<4x8x8xf32>, vector<4x8x8xf32> -> vector<4x8x8xf32>
    "tpu.trace_stop"() : () -> ()
    %57 = vector.extract_strided_slice %56 {offsets = [0, 0, 0], sizes = [1, 8, 8], strides = [1, 1, 1]} : vector<4x8x8xf32> to vector<1x8x8xf32>
    %58 = vector.shape_cast %57 : vector<1x8x8xf32> to vector<8x8xf32>
    %59 = vector.extract_strided_slice %56 {offsets = [1, 0, 0], sizes = [1, 8, 8], strides = [1, 1, 1]} : vector<4x8x8xf32> to vector<1x8x8xf32>
    %60 = vector.shape_cast %59 : vector<1x8x8xf32> to vector<8x8xf32>
    %61 = vector.extract_strided_slice %56 {offsets = [2, 0, 0], sizes = [1, 8, 8], strides = [1, 1, 1]} : vector<4x8x8xf32> to vector<1x8x8xf32>
    %62 = vector.shape_cast %61 : vector<1x8x8xf32> to vector<8x8xf32>
    %63 = vector.extract_strided_slice %56 {offsets = [3, 0, 0], sizes = [1, 8, 8], strides = [1, 1, 1]} : vector<4x8x8xf32> to vector<1x8x8xf32>
    %64 = vector.shape_cast %63 : vector<1x8x8xf32> to vector<8x8xf32>
    %65 = tpu.concatenate %58, %60, %62, %64 in 1 : vector<8x8xf32>, vector<8x8xf32>, vector<8x8xf32>, vector<8x8xf32> -> vector<8x32xf32>
    %c0_18 = arith.constant 0 : index
    %c0_19 = arith.constant 0 : index
    %c0_20 = arith.constant 0 : index
    %66 = vector.load %arg6[%c0_18, %c0_19, %c0_20] : memref<2x32x32xf32, #tpu.memory_space<vmem>>, vector<1x32x32xf32>
    %67 = vector.shape_cast %66 : vector<1x32x32xf32> to vector<32x32xf32>
    %cst_21 = arith.constant dense<0.000000e+00> : vector<8x32xf32>
    %68 = tpu.matmul %65, %67, %cst_21 {dimension_numbers = #tpu.dot_dimension_numbers<[1], [0], [0], [1], [0, 0, 1, 1], [], []>} : vector<8x32xf32>, vector<32x32xf32>, vector<8x32xf32> -> vector<8x32xf32>
    %c0_22 = arith.constant 0 : index
    %c0_23 = arith.constant 0 : index
    %c0_24 = arith.constant 0 : index
    %69 = vector.load %arg7[%c0_22, %c0_23, %c0_24] : memref<2x1x32xf32, #tpu.memory_space<vmem>>, vector<1x1x32xf32>
    %70 = vector.shape_cast %69 : vector<1x1x32xf32> to vector<1x32xf32>
    %71 = vector.broadcast %70 : vector<1x32xf32> to vector<8x32xf32>
    %72 = arith.addf %68, %71 : vector<8x32xf32>
    %73 = arith.addf %5, %72 : vector<8x32xf32>
    %c0_25 = arith.constant 0 : index
    %c0_26 = arith.constant 0 : index
    %c0_27 = arith.constant 0 : index
    %74 = vector.load %arg12[%c0_25, %c0_26, %c0_27] : memref<2x1x32xf32, #tpu.memory_space<vmem>>, vector<1x1x32xf32>
    %75 = vector.shape_cast %74 : vector<1x1x32xf32> to vector<1x32xf32>
    %c0_28 = arith.constant 0 : index
    %c0_29 = arith.constant 0 : index
    %c0_30 = arith.constant 0 : index
    %76 = vector.load %arg13[%c0_28, %c0_29, %c0_30] : memref<2x1x32xf32, #tpu.memory_space<vmem>>, vector<1x1x32xf32>
    %77 = vector.shape_cast %76 : vector<1x1x32xf32> to vector<1x32xf32>
    %cst_31 = arith.constant dense<0.000000e+00> : vector<8xf32>
    %78 = vector.multi_reduction <add>, %73, %cst_31 [1] : vector<8x32xf32> to vector<8xf32>
    %79 = vector.shape_cast %78 : vector<8xf32> to vector<8x1xf32>
    %cst_32 = arith.constant 3.200000e+01 : f32
    %80 = vector.broadcast %cst_32 : f32 to vector<8x1xf32>
    %81 = arith.divf %79, %80 : vector<8x1xf32>
    %82 = vector.broadcast %81 : vector<8x1xf32> to vector<8x32xf32>
    %83 = arith.subf %73, %82 : vector<8x32xf32>
    %84 = arith.mulf %83, %83 : vector<8x32xf32>
    %cst_33 = arith.constant dense<0.000000e+00> : vector<8xf32>
    %85 = vector.multi_reduction <add>, %84, %cst_33 [1] : vector<8x32xf32> to vector<8xf32>
    %86 = vector.shape_cast %85 : vector<8xf32> to vector<8x1xf32>
    %cst_34 = arith.constant 3.200000e+01 : f32
    %87 = vector.broadcast %cst_34 : f32 to vector<8x1xf32>
    %88 = arith.divf %86, %87 : vector<8x1xf32>
    %89 = vector.broadcast %81 : vector<8x1xf32> to vector<8x32xf32>
    %90 = arith.subf %73, %89 : vector<8x32xf32>
    %cst_35 = arith.constant 9.99999974E-6 : f32
    %91 = vector.broadcast %cst_35 : f32 to vector<8x1xf32>
    %92 = arith.addf %88, %91 : vector<8x1xf32>
    %93 = math.rsqrt %92 : vector<8x1xf32>
    %94 = vector.broadcast %93 : vector<8x1xf32> to vector<8x32xf32>
    %95 = arith.mulf %90, %94 : vector<8x32xf32>
    %96 = vector.broadcast %75 : vector<1x32xf32> to vector<8x32xf32>
    %97 = arith.mulf %95, %96 : vector<8x32xf32>
    %98 = vector.broadcast %77 : vector<1x32xf32> to vector<8x32xf32>
    %99 = arith.addf %97, %98 : vector<8x32xf32>
    %c0_36 = arith.constant 0 : index
    %c0_37 = arith.constant 0 : index
    %c0_38 = arith.constant 0 : index
    %100 = vector.load %arg8[%c0_36, %c0_37, %c0_38] : memref<2x32x64xf32, #tpu.memory_space<vmem>>, vector<1x32x64xf32>
    %101 = vector.shape_cast %100 : vector<1x32x64xf32> to vector<32x64xf32>
    %cst_39 = arith.constant dense<0.000000e+00> : vector<8x64xf32>
    %102 = tpu.matmul %99, %101, %cst_39 {dimension_numbers = #tpu.dot_dimension_numbers<[1], [0], [0], [1], [0, 0, 1, 1], [], []>} : vector<8x32xf32>, vector<32x64xf32>, vector<8x64xf32> -> vector<8x64xf32>
    %c0_40 = arith.constant 0 : index
    %c0_41 = arith.constant 0 : index
    %c0_42 = arith.constant 0 : index
    %103 = vector.load %arg9[%c0_40, %c0_41, %c0_42] : memref<2x1x64xf32, #tpu.memory_space<vmem>>, vector<1x1x64xf32>
    %104 = vector.shape_cast %103 : vector<1x1x64xf32> to vector<1x64xf32>
    %105 = vector.broadcast %104 : vector<1x64xf32> to vector<8x64xf32>
    %106 = arith.addf %102, %105 : vector<8x64xf32>
    %cst_43 = arith.constant 0.000000e+00 : f32
    %107 = vector.broadcast %cst_43 : f32 to vector<8x64xf32>
    %108 = arith.maximumf %106, %107 : vector<8x64xf32>
    %c0_44 = arith.constant 0 : index
    %c0_45 = arith.constant 0 : index
    %c0_46 = arith.constant 0 : index
    %109 = vector.load %arg10[%c0_44, %c0_45, %c0_46] : memref<2x64x32xf32, #tpu.memory_space<vmem>>, vector<1x64x32xf32>
    %110 = vector.shape_cast %109 : vector<1x64x32xf32> to vector<64x32xf32>
    %cst_47 = arith.constant dense<0.000000e+00> : vector<8x32xf32>
    %111 = tpu.matmul %108, %110, %cst_47 {dimension_numbers = #tpu.dot_dimension_numbers<[1], [0], [0], [1], [0, 0, 1, 1], [], []>} : vector<8x64xf32>, vector<64x32xf32>, vector<8x32xf32> -> vector<8x32xf32>
    %c0_48 = arith.constant 0 : index
    %c0_49 = arith.constant 0 : index
    %c0_50 = arith.constant 0 : index
    %112 = vector.load %arg11[%c0_48, %c0_49, %c0_50] : memref<2x1x32xf32, #tpu.memory_space<vmem>>, vector<1x1x32xf32>
    %113 = vector.shape_cast %112 : vector<1x1x32xf32> to vector<1x32xf32>
    %114 = vector.broadcast %113 : vector<1x32xf32> to vector<8x32xf32>
    %115 = arith.addf %111, %114 : vector<8x32xf32>
    %116 = arith.addf %99, %115 : vector<8x32xf32>
    %c0_51 = arith.constant 0 : index
    %c0_52 = arith.constant 0 : index
    %c0_53 = arith.constant 0 : index
    %117 = vector.load %arg14[%c0_51, %c0_52, %c0_53] : memref<2x1x32xf32, #tpu.memory_space<vmem>>, vector<1x1x32xf32>
    %118 = vector.shape_cast %117 : vector<1x1x32xf32> to vector<1x32xf32>
    %c0_54 = arith.constant 0 : index
    %c0_55 = arith.constant 0 : index
    %c0_56 = arith.constant 0 : index
    %119 = vector.load %arg15[%c0_54, %c0_55, %c0_56] : memref<2x1x32xf32, #tpu.memory_space<vmem>>, vector<1x1x32xf32>
    %120 = vector.shape_cast %119 : vector<1x1x32xf32> to vector<1x32xf32>
    %cst_57 = arith.constant dense<0.000000e+00> : vector<8xf32>
    %121 = vector.multi_reduction <add>, %116, %cst_57 [1] : vector<8x32xf32> to vector<8xf32>
    %122 = vector.shape_cast %121 : vector<8xf32> to vector<8x1xf32>
    %cst_58 = arith.constant 3.200000e+01 : f32
    %123 = vector.broadcast %cst_58 : f32 to vector<8x1xf32>
    %124 = arith.divf %122, %123 : vector<8x1xf32>
    %125 = vector.broadcast %124 : vector<8x1xf32> to vector<8x32xf32>
    %126 = arith.subf %116, %125 : vector<8x32xf32>
    %127 = arith.mulf %126, %126 : vector<8x32xf32>
    %cst_59 = arith.constant dense<0.000000e+00> : vector<8xf32>
    %128 = vector.multi_reduction <add>, %127, %cst_59 [1] : vector<8x32xf32> to vector<8xf32>
    %129 = vector.shape_cast %128 : vector<8xf32> to vector<8x1xf32>
    %cst_60 = arith.constant 3.200000e+01 : f32
    %130 = vector.broadcast %cst_60 : f32 to vector<8x1xf32>
    %131 = arith.divf %129, %130 : vector<8x1xf32>
    %132 = vector.broadcast %124 : vector<8x1xf32> to vector<8x32xf32>
    %133 = arith.subf %116, %132 : vector<8x32xf32>
    %cst_61 = arith.constant 9.99999974E-6 : f32
    %134 = vector.broadcast %cst_61 : f32 to vector<8x1xf32>
    %135 = arith.addf %131, %134 : vector<8x1xf32>
    %136 = math.rsqrt %135 : vector<8x1xf32>
    %137 = vector.broadcast %136 : vector<8x1xf32> to vector<8x32xf32>
    %138 = arith.mulf %133, %137 : vector<8x32xf32>
    %139 = vector.broadcast %118 : vector<1x32xf32> to vector<8x32xf32>
    %140 = arith.mulf %138, %139 : vector<8x32xf32>
    %141 = vector.broadcast %120 : vector<1x32xf32> to vector<8x32xf32>
    %142 = arith.addf %140, %141 : vector<8x32xf32>
    %c1 = arith.constant 1 : index
    %c0_62 = arith.constant 0 : index
    %c0_63 = arith.constant 0 : index
    %143 = vector.load %arg4[%c1, %c0_62, %c0_63] : memref<2x32x96xf32, #tpu.memory_space<vmem>>, vector<1x32x96xf32>
    %144 = vector.shape_cast %143 : vector<1x32x96xf32> to vector<32x96xf32>
    %cst_64 = arith.constant dense<0.000000e+00> : vector<8x96xf32>
    %145 = tpu.matmul %142, %144, %cst_64 {dimension_numbers = #tpu.dot_dimension_numbers<[1], [0], [0], [1], [0, 0, 1, 1], [], []>} : vector<8x32xf32>, vector<32x96xf32>, vector<8x96xf32> -> vector<8x96xf32>
    %c1_65 = arith.constant 1 : index
    %c0_66 = arith.constant 0 : index
    %c0_67 = arith.constant 0 : index
    %146 = vector.load %arg5[%c1_65, %c0_66, %c0_67] : memref<2x1x96xf32, #tpu.memory_space<vmem>>, vector<1x1x96xf32>
    %147 = vector.shape_cast %146 : vector<1x1x96xf32> to vector<1x96xf32>
    %148 = vector.broadcast %147 : vector<1x96xf32> to vector<8x96xf32>
    %149 = arith.addf %145, %148 : vector<8x96xf32>
    %150 = vector.extract_strided_slice %149 {offsets = [0, 0], sizes = [8, 32], strides = [1, 1]} : vector<8x96xf32> to vector<8x32xf32>
    %cst_68 = arith.constant 0.353553385 : f32
    %151 = vector.broadcast %cst_68 : f32 to vector<8x32xf32>
    %152 = arith.mulf %150, %151 : vector<8x32xf32>
    %153 = vector.extract_strided_slice %149 {offsets = [0, 32], sizes = [8, 32], strides = [1, 1]} : vector<8x96xf32> to vector<8x32xf32>
    %154 = vector.extract_strided_slice %149 {offsets = [0, 64], sizes = [8, 32], strides = [1, 1]} : vector<8x96xf32> to vector<8x32xf32>
    %155 = vector.extract_strided_slice %152 {offsets = [0, 0], sizes = [8, 8], strides = [1, 1]} : vector<8x32xf32> to vector<8x8xf32>
    %156 = vector.extract_strided_slice %152 {offsets = [0, 8], sizes = [8, 8], strides = [1, 1]} : vector<8x32xf32> to vector<8x8xf32>
    %157 = vector.extract_strided_slice %152 {offsets = [0, 16], sizes = [8, 8], strides = [1, 1]} : vector<8x32xf32> to vector<8x8xf32>
    %158 = vector.extract_strided_slice %152 {offsets = [0, 24], sizes = [8, 8], strides = [1, 1]} : vector<8x32xf32> to vector<8x8xf32>
    %159 = vector.shape_cast %155 : vector<8x8xf32> to vector<1x8x8xf32>
    %160 = vector.shape_cast %156 : vector<8x8xf32> to vector<1x8x8xf32>
    %161 = vector.shape_cast %157 : vector<8x8xf32> to vector<1x8x8xf32>
    %162 = vector.shape_cast %158 : vector<8x8xf32> to vector<1x8x8xf32>
    %163 = tpu.concatenate %159, %160, %161, %162 in 0 : vector<1x8x8xf32>, vector<1x8x8xf32>, vector<1x8x8xf32>, vector<1x8x8xf32> -> vector<4x8x8xf32>
    %164 = vector.extract_strided_slice %153 {offsets = [0, 0], sizes = [8, 8], strides = [1, 1]} : vector<8x32xf32> to vector<8x8xf32>
    %165 = vector.extract_strided_slice %153 {offsets = [0, 8], sizes = [8, 8], strides = [1, 1]} : vector<8x32xf32> to vector<8x8xf32>
    %166 = vector.extract_strided_slice %153 {offsets = [0, 16], sizes = [8, 8], strides = [1, 1]} : vector<8x32xf32> to vector<8x8xf32>
    %167 = vector.extract_strided_slice %153 {offsets = [0, 24], sizes = [8, 8], strides = [1, 1]} : vector<8x32xf32> to vector<8x8xf32>
    %168 = vector.shape_cast %164 : vector<8x8xf32> to vector<1x8x8xf32>
    %169 = vector.shape_cast %165 : vector<8x8xf32> to vector<1x8x8xf32>
    %170 = vector.shape_cast %166 : vector<8x8xf32> to vector<1x8x8xf32>
    %171 = vector.shape_cast %167 : vector<8x8xf32> to vector<1x8x8xf32>
    %172 = tpu.concatenate %168, %169, %170, %171 in 0 : vector<1x8x8xf32>, vector<1x8x8xf32>, vector<1x8x8xf32>, vector<1x8x8xf32> -> vector<4x8x8xf32>
    %173 = vector.extract_strided_slice %154 {offsets = [0, 0], sizes = [8, 8], strides = [1, 1]} : vector<8x32xf32> to vector<8x8xf32>
    %174 = vector.extract_strided_slice %154 {offsets = [0, 8], sizes = [8, 8], strides = [1, 1]} : vector<8x32xf32> to vector<8x8xf32>
    %175 = vector.extract_strided_slice %154 {offsets = [0, 16], sizes = [8, 8], strides = [1, 1]} : vector<8x32xf32> to vector<8x8xf32>
    %176 = vector.extract_strided_slice %154 {offsets = [0, 24], sizes = [8, 8], strides = [1, 1]} : vector<8x32xf32> to vector<8x8xf32>
    %177 = vector.shape_cast %173 : vector<8x8xf32> to vector<1x8x8xf32>
    %178 = vector.shape_cast %174 : vector<8x8xf32> to vector<1x8x8xf32>
    %179 = vector.shape_cast %175 : vector<8x8xf32> to vector<1x8x8xf32>
    %180 = vector.shape_cast %176 : vector<8x8xf32> to vector<1x8x8xf32>
    %181 = tpu.concatenate %177, %178, %179, %180 in 0 : vector<1x8x8xf32>, vector<1x8x8xf32>, vector<1x8x8xf32>, vector<1x8x8xf32> -> vector<4x8x8xf32>
    "tpu.trace_start"() <{level = 10 : i32, message = "hqd,hkd->hqk"}> : () -> ()
    %cst_69 = arith.constant dense<0.000000e+00> : vector<4x8x8xf32>
    %182 = tpu.matmul %163, %172, %cst_69 {dimension_numbers = #tpu.dot_dimension_numbers<[2], [2], [1], [1], [0, 0, 0, 1, 1, 1], [0], [0]>} : vector<4x8x8xf32>, vector<4x8x8xf32>, vector<4x8x8xf32> -> vector<4x8x8xf32>
    "tpu.trace_stop"() : () -> ()
    %cst_70 = arith.constant dense<0xFF800000> : vector<4x8xf32>
    %183 = vector.multi_reduction <maximumf>, %182, %cst_70 [2] : vector<4x8x8xf32> to vector<4x8xf32>
    %184 = vector.shape_cast %183 : vector<4x8xf32> to vector<4x8x1xf32>
    %185 = vector.broadcast %184 : vector<4x8x1xf32> to vector<4x8x8xf32>
    %186 = arith.subf %182, %185 : vector<4x8x8xf32>
    %187 = math.exp %186 : vector<4x8x8xf32>
    %cst_71 = arith.constant dense<0.000000e+00> : vector<4x8xf32>
    %188 = vector.multi_reduction <add>, %187, %cst_71 [2] : vector<4x8x8xf32> to vector<4x8xf32>
    %189 = vector.shape_cast %188 : vector<4x8xf32> to vector<4x8x1xf32>
    %190 = tpu.reciprocal %189 {approx = true} : vector<4x8x1xf32> -> vector<4x8x1xf32>
    %191 = vector.broadcast %190 : vector<4x8x1xf32> to vector<4x8x8xf32>
    %192 = arith.mulf %187, %191 : vector<4x8x8xf32>
    "tpu.trace_start"() <{level = 10 : i32, message = "hqk,hkd->hqd"}> : () -> ()
    %cst_72 = arith.constant dense<0.000000e+00> : vector<4x8x8xf32>
    %193 = tpu.matmul %192, %181, %cst_72 {dimension_numbers = #tpu.dot_dimension_numbers<[2], [1], [1], [2], [0, 0, 0, 1, 1, 2], [0], [0]>} : vector<4x8x8xf32>, vector<4x8x8xf32>, vector<4x8x8xf32> -> vector<4x8x8xf32>
    "tpu.trace_stop"() : () -> ()
    %194 = vector.extract_strided_slice %193 {offsets = [0, 0, 0], sizes = [1, 8, 8], strides = [1, 1, 1]} : vector<4x8x8xf32> to vector<1x8x8xf32>
    %195 = vector.shape_cast %194 : vector<1x8x8xf32> to vector<8x8xf32>
    %196 = vector.extract_strided_slice %193 {offsets = [1, 0, 0], sizes = [1, 8, 8], strides = [1, 1, 1]} : vector<4x8x8xf32> to vector<1x8x8xf32>
    %197 = vector.shape_cast %196 : vector<1x8x8xf32> to vector<8x8xf32>
    %198 = vector.extract_strided_slice %193 {offsets = [2, 0, 0], sizes = [1, 8, 8], strides = [1, 1, 1]} : vector<4x8x8xf32> to vector<1x8x8xf32>
    %199 = vector.shape_cast %198 : vector<1x8x8xf32> to vector<8x8xf32>
    %200 = vector.extract_strided_slice %193 {offsets = [3, 0, 0], sizes = [1, 8, 8], strides = [1, 1, 1]} : vector<4x8x8xf32> to vector<1x8x8xf32>
    %201 = vector.shape_cast %200 : vector<1x8x8xf32> to vector<8x8xf32>
    %202 = tpu.concatenate %195, %197, %199, %201 in 1 : vector<8x8xf32>, vector<8x8xf32>, vector<8x8xf32>, vector<8x8xf32> -> vector<8x32xf32>
    %c1_73 = arith.constant 1 : index
    %c0_74 = arith.constant 0 : index
    %c0_75 = arith.constant 0 : index
    %203 = vector.load %arg6[%c1_73, %c0_74, %c0_75] : memref<2x32x32xf32, #tpu.memory_space<vmem>>, vector<1x32x32xf32>
    %204 = vector.shape_cast %203 : vector<1x32x32xf32> to vector<32x32xf32>
    %cst_76 = arith.constant dense<0.000000e+00> : vector<8x32xf32>
    %205 = tpu.matmul %202, %204, %cst_76 {dimension_numbers = #tpu.dot_dimension_numbers<[1], [0], [0], [1], [0, 0, 1, 1], [], []>} : vector<8x32xf32>, vector<32x32xf32>, vector<8x32xf32> -> vector<8x32xf32>
    %c1_77 = arith.constant 1 : index
    %c0_78 = arith.constant 0 : index
    %c0_79 = arith.constant 0 : index
    %206 = vector.load %arg7[%c1_77, %c0_78, %c0_79] : memref<2x1x32xf32, #tpu.memory_space<vmem>>, vector<1x1x32xf32>
    %207 = vector.shape_cast %206 : vector<1x1x32xf32> to vector<1x32xf32>
    %208 = vector.broadcast %207 : vector<1x32xf32> to vector<8x32xf32>
    %209 = arith.addf %205, %208 : vector<8x32xf32>
    %210 = arith.addf %142, %209 : vector<8x32xf32>
    %c1_80 = arith.constant 1 : index
    %c0_81 = arith.constant 0 : index
    %c0_82 = arith.constant 0 : index
    %211 = vector.load %arg12[%c1_80, %c0_81, %c0_82] : memref<2x1x32xf32, #tpu.memory_space<vmem>>, vector<1x1x32xf32>
    %212 = vector.shape_cast %211 : vector<1x1x32xf32> to vector<1x32xf32>
    %c1_83 = arith.constant 1 : index
    %c0_84 = arith.constant 0 : index
    %c0_85 = arith.constant 0 : index
    %213 = vector.load %arg13[%c1_83, %c0_84, %c0_85] : memref<2x1x32xf32, #tpu.memory_space<vmem>>, vector<1x1x32xf32>
    %214 = vector.shape_cast %213 : vector<1x1x32xf32> to vector<1x32xf32>
    %cst_86 = arith.constant dense<0.000000e+00> : vector<8xf32>
    %215 = vector.multi_reduction <add>, %210, %cst_86 [1] : vector<8x32xf32> to vector<8xf32>
    %216 = vector.shape_cast %215 : vector<8xf32> to vector<8x1xf32>
    %cst_87 = arith.constant 3.200000e+01 : f32
    %217 = vector.broadcast %cst_87 : f32 to vector<8x1xf32>
    %218 = arith.divf %216, %217 : vector<8x1xf32>
    %219 = vector.broadcast %218 : vector<8x1xf32> to vector<8x32xf32>
    %220 = arith.subf %210, %219 : vector<8x32xf32>
    %221 = arith.mulf %220, %220 : vector<8x32xf32>
    %cst_88 = arith.constant dense<0.000000e+00> : vector<8xf32>
    %222 = vector.multi_reduction <add>, %221, %cst_88 [1] : vector<8x32xf32> to vector<8xf32>
    %223 = vector.shape_cast %222 : vector<8xf32> to vector<8x1xf32>
    %cst_89 = arith.constant 3.200000e+01 : f32
    %224 = vector.broadcast %cst_89 : f32 to vector<8x1xf32>
    %225 = arith.divf %223, %224 : vector<8x1xf32>
    %226 = vector.broadcast %218 : vector<8x1xf32> to vector<8x32xf32>
    %227 = arith.subf %210, %226 : vector<8x32xf32>
    %cst_90 = arith.constant 9.99999974E-6 : f32
    %228 = vector.broadcast %cst_90 : f32 to vector<8x1xf32>
    %229 = arith.addf %225, %228 : vector<8x1xf32>
    %230 = math.rsqrt %229 : vector<8x1xf32>
    %231 = vector.broadcast %230 : vector<8x1xf32> to vector<8x32xf32>
    %232 = arith.mulf %227, %231 : vector<8x32xf32>
    %233 = vector.broadcast %212 : vector<1x32xf32> to vector<8x32xf32>
    %234 = arith.mulf %232, %233 : vector<8x32xf32>
    %235 = vector.broadcast %214 : vector<1x32xf32> to vector<8x32xf32>
    %236 = arith.addf %234, %235 : vector<8x32xf32>
    %c1_91 = arith.constant 1 : index
    %c0_92 = arith.constant 0 : index
    %c0_93 = arith.constant 0 : index
    %237 = vector.load %arg8[%c1_91, %c0_92, %c0_93] : memref<2x32x64xf32, #tpu.memory_space<vmem>>, vector<1x32x64xf32>
    %238 = vector.shape_cast %237 : vector<1x32x64xf32> to vector<32x64xf32>
    %cst_94 = arith.constant dense<0.000000e+00> : vector<8x64xf32>
    %239 = tpu.matmul %236, %238, %cst_94 {dimension_numbers = #tpu.dot_dimension_numbers<[1], [0], [0], [1], [0, 0, 1, 1], [], []>} : vector<8x32xf32>, vector<32x64xf32>, vector<8x64xf32> -> vector<8x64xf32>
    %c1_95 = arith.constant 1 : index
    %c0_96 = arith.constant 0 : index
    %c0_97 = arith.constant 0 : index
    %240 = vector.load %arg9[%c1_95, %c0_96, %c0_97] : memref<2x1x64xf32, #tpu.memory_space<vmem>>, vector<1x1x64xf32>
    %241 = vector.shape_cast %240 : vector<1x1x64xf32> to vector<1x64xf32>
    %242 = vector.broadcast %241 : vector<1x64xf32> to vector<8x64xf32>
    %243 = arith.addf %239, %242 : vector<8x64xf32>
    %cst_98 = arith.constant 0.000000e+00 : f32
    %244 = vector.broadcast %cst_98 : f32 to vector<8x64xf32>
    %245 = arith.maximumf %243, %244 : vector<8x64xf32>
    %c1_99 = arith.constant 1 : index
    %c0_100 = arith.constant 0 : index
    %c0_101 = arith.constant 0 : index
    %246 = vector.load %arg10[%c1_99, %c0_100, %c0_101] : memref<2x64x32xf32, #tpu.memory_space<vmem>>, vector<1x64x32xf32>
    %247 = vector.shape_cast %246 : vector<1x64x32xf32> to vector<64x32xf32>
    %cst_102 = arith.constant dense<0.000000e+00> : vector<8x32xf32>
    %248 = tpu.matmul %245, %247, %cst_102 {dimension_numbers = #tpu.dot_dimension_numbers<[1], [0], [0], [1], [0, 0, 1, 1], [], []>} : vector<8x64xf32>, vector<64x32xf32>, vector<8x32xf32> -> vector<8x32xf32>
    %c1_103 = arith.constant 1 : index
    %c0_104 = arith.constant 0 : index
    %c0_105 = arith.constant 0 : index
    %249 = vector.load %arg11[%c1_103, %c0_104, %c0_105] : memref<2x1x32xf32, #tpu.memory_space<vmem>>, vector<1x1x32xf32>
    %250 = vector.shape_cast %249 : vector<1x1x32xf32> to vector<1x32xf32>
    %251 = vector.broadcast %250 : vector<1x32xf32> to vector<8x32xf32>
    %252 = arith.addf %248, %251 : vector<8x32xf32>
    %253 = arith.addf %236, %252 : vector<8x32xf32>
    %c1_106 = arith.constant 1 : index
    %c0_107 = arith.constant 0 : index
    %c0_108 = arith.constant 0 : index
    %254 = vector.load %arg14[%c1_106, %c0_107, %c0_108] : memref<2x1x32xf32, #tpu.memory_space<vmem>>, vector<1x1x32xf32>
    %255 = vector.shape_cast %254 : vector<1x1x32xf32> to vector<1x32xf32>
    %c1_109 = arith.constant 1 : index
    %c0_110 = arith.constant 0 : index
    %c0_111 = arith.constant 0 : index
    %256 = vector.load %arg15[%c1_109, %c0_110, %c0_111] : memref<2x1x32xf32, #tpu.memory_space<vmem>>, vector<1x1x32xf32>
    %257 = vector.shape_cast %256 : vector<1x1x32xf32> to vector<1x32xf32>
    %cst_112 = arith.constant dense<0.000000e+00> : vector<8xf32>
    %258 = vector.multi_reduction <add>, %253, %cst_112 [1] : vector<8x32xf32> to vector<8xf32>
    %259 = vector.shape_cast %258 : vector<8xf32> to vector<8x1xf32>
    %cst_113 = arith.constant 3.200000e+01 : f32
    %260 = vector.broadcast %cst_113 : f32 to vector<8x1xf32>
    %261 = arith.divf %259, %260 : vector<8x1xf32>
    %262 = vector.broadcast %261 : vector<8x1xf32> to vector<8x32xf32>
    %263 = arith.subf %253, %262 : vector<8x32xf32>
    %264 = arith.mulf %263, %263 : vector<8x32xf32>
    %cst_114 = arith.constant dense<0.000000e+00> : vector<8xf32>
    %265 = vector.multi_reduction <add>, %264, %cst_114 [1] : vector<8x32xf32> to vector<8xf32>
    %266 = vector.shape_cast %265 : vector<8xf32> to vector<8x1xf32>
    %cst_115 = arith.constant 3.200000e+01 : f32
    %267 = vector.broadcast %cst_115 : f32 to vector<8x1xf32>
    %268 = arith.divf %266, %267 : vector<8x1xf32>
    %269 = vector.broadcast %261 : vector<8x1xf32> to vector<8x32xf32>
    %270 = arith.subf %253, %269 : vector<8x32xf32>
    %cst_116 = arith.constant 9.99999974E-6 : f32
    %271 = vector.broadcast %cst_116 : f32 to vector<8x1xf32>
    %272 = arith.addf %268, %271 : vector<8x1xf32>
    %273 = math.rsqrt %272 : vector<8x1xf32>
    %274 = vector.broadcast %273 : vector<8x1xf32> to vector<8x32xf32>
    %275 = arith.mulf %270, %274 : vector<8x32xf32>
    %276 = vector.broadcast %255 : vector<1x32xf32> to vector<8x32xf32>
    %277 = arith.mulf %275, %276 : vector<8x32xf32>
    %278 = vector.broadcast %257 : vector<1x32xf32> to vector<8x32xf32>
    %279 = arith.addf %277, %278 : vector<8x32xf32>
    %c0_117 = arith.constant 0 : index
    %c0_118 = arith.constant 0 : index
    %c0_119 = arith.constant 0 : index
    %280 = vector.load %arg16[%c0_117, %c0_118, %c0_119] : memref<1x8x32xf32, #tpu.memory_space<vmem>>, vector<1x8x32xf32>
    %281 = vector.shape_cast %280 : vector<1x8x32xf32> to vector<8x32xf32>
    %282 = vector.shape_cast %279 : vector<8x32xf32> to vector<1x8x32xf32>
    tpu.vector_store %arg16[%c0_117, %c0_118, %c0_119], %282 {strides = array<i32>} : memref<1x8x32xf32, #tpu.memory_space<vmem>>, vector<1x8x32xf32>,
    return
  }
  func.func @transform_0(%arg0: i32) -> (i32, i32, i32) {
    %c0_i32 = arith.constant 0 : i32
    %c0_i32_0 = arith.constant 0 : i32
    %c0_i32_1 = arith.constant 0 : i32
    return %arg0, %c0_i32, %c0_i32_0 : i32, i32, i32
  }
  func.func @transform_1(%arg0: i32) -> (i32, i32) {
    %c0_i32 = arith.constant 0 : i32
    %c0_i32_0 = arith.constant 0 : i32
    %c0_i32_1 = arith.constant 0 : i32
    return %c0_i32, %c0_i32_0 : i32, i32
  }
  func.func @transform_2(%arg0: i32) -> (i32, i32) {
    %c0_i32 = arith.constant 0 : i32
    %c0_i32_0 = arith.constant 0 : i32
    %c0_i32_1 = arith.constant 0 : i32
    return %c0_i32, %c0_i32_0 : i32, i32
  }
  func.func @transform_3(%arg0: i32) -> (i32, i32, i32) {
    %c0_i32 = arith.constant 0 : i32
    %c0_i32_0 = arith.constant 0 : i32
    %c0_i32_1 = arith.constant 0 : i32
    %c0_i32_2 = arith.constant 0 : i32
    return %c0_i32, %c0_i32_0, %c0_i32_1 : i32, i32, i32
  }
  func.func @transform_4(%arg0: i32) -> (i32, i32, i32) {
    %c0_i32 = arith.constant 0 : i32
    %c0_i32_0 = arith.constant 0 : i32
    %c0_i32_1 = arith.constant 0 : i32
    %c0_i32_2 = arith.constant 0 : i32
    return %c0_i32, %c0_i32_0, %c0_i32_1 : i32, i32, i32
  }
  func.func @transform_5(%arg0: i32) -> (i32, i32, i32) {
    %c0_i32 = arith.constant 0 : i32
    %c0_i32_0 = arith.constant 0 : i32
    %c0_i32_1 = arith.constant 0 : i32
    %c0_i32_2 = arith.constant 0 : i32
    return %c0_i32, %c0_i32_0, %c0_i32_1 : i32, i32, i32
  }
  func.func @transform_6(%arg0: i32) -> (i32, i32, i32) {
    %c0_i32 = arith.constant 0 : i32
    %c0_i32_0 = arith.constant 0 : i32
    %c0_i32_1 = arith.constant 0 : i32
    %c0_i32_2 = arith.constant 0 : i32
    return %c0_i32, %c0_i32_0, %c0_i32_1 : i32, i32, i32
  }
  func.func @transform_7(%arg0: i32) -> (i32, i32, i32) {
    %c0_i32 = arith.constant 0 : i32
    %c0_i32_0 = arith.constant 0 : i32
    %c0_i32_1 = arith.constant 0 : i32
    %c0_i32_2 = arith.constant 0 : i32
    return %c0_i32, %c0_i32_0, %c0_i32_1 : i32, i32, i32
  }
  func.func @transform_8(%arg0: i32) -> (i32, i32, i32) {
    %c0_i32 = arith.constant 0 : i32
    %c0_i32_0 = arith.constant 0 : i32
    %c0_i32_1 = arith.constant 0 : i32
    %c0_i32_2 = arith.constant 0 : i32
    return %c0_i32, %c0_i32_0, %c0_i32_1 : i32, i32, i32
  }
  func.func @transform_9(%arg0: i32) -> (i32, i32, i32) {
    %c0_i32 = arith.constant 0 : i32
    %c0_i32_0 = arith.constant 0 : i32
    %c0_i32_1 = arith.constant 0 : i32
    %c0_i32_2 = arith.constant 0 : i32
    return %c0_i32, %c0_i32_0, %c0_i32_1 : i32, i32, i32
  }
  func.func @transform_10(%arg0: i32) -> (i32, i32, i32) {
    %c0_i32 = arith.constant 0 : i32
    %c0_i32_0 = arith.constant 0 : i32
    %c0_i32_1 = arith.constant 0 : i32
    %c0_i32_2 = arith.constant 0 : i32
    return %c0_i32, %c0_i32_0, %c0_i32_1 : i32, i32, i32
  }
  func.func @transform_11(%arg0: i32) -> (i32, i32, i32) {
    %c0_i32 = arith.constant 0 : i32
    %c0_i32_0 = arith.constant 0 : i32
    %c0_i32_1 = arith.constant 0 : i32
    %c0_i32_2 = arith.constant 0 : i32
    return %c0_i32, %c0_i32_0, %c0_i32_1 : i32, i32, i32
  }
  func.func @transform_12(%arg0: i32) -> (i32, i32, i32) {
    %c0_i32 = arith.constant 0 : i32
    %c0_i32_0 = arith.constant 0 : i32
    %c0_i32_1 = arith.constant 0 : i32
    %c0_i32_2 = arith.constant 0 : i32
    return %c0_i32, %c0_i32_0, %c0_i32_1 : i32, i32, i32
  }
  func.func @transform_13(%arg0: i32) -> (i32, i32, i32) {
    %c0_i32 = arith.constant 0 : i32
    %c0_i32_0 = arith.constant 0 : i32
    %c0_i32_1 = arith.constant 0 : i32
    %c0_i32_2 = arith.constant 0 : i32
    return %c0_i32, %c0_i32_0, %c0_i32_1 : i32, i32, i32
  }
  func.func @transform_14(%arg0: i32) -> (i32, i32, i32) {
    %c0_i32 = arith.constant 0 : i32
    %c0_i32_0 = arith.constant 0 : i32
    %c0_i32_1 = arith.constant 0 : i32
    %c0_i32_2 = arith.constant 0 : i32
    return %c0_i32, %c0_i32_0, %c0_i32_1 : i32, i32, i32
  }
  func.func @transform_15(%arg0: i32) -> (i32, i32, i32) {
    %c0_i32 = arith.constant 0 : i32
    %c0_i32_0 = arith.constant 0 : i32
    %c0_i32_1 = arith.constant 0 : i32
    return %arg0, %c0_i32, %c0_i32_0 : i32, i32, i32
  }
}

</mosaic_0001>

<bundles_post_ra>
// kernel: tpu_custom_call.1
= control target key start
LH: loop header
LB: loop body
LE: loop exit
PB: predicated region body
PF: predicated region fallthrough
CT: control target
= control target key end

     0   :  { %s2807_s0 = inlined_call_operand.hbm [shape: f32[2,8,16], index: 0, kind: input, shape index: {}]   ;;  %s2808_s1 = inlined_call_operand.hbm [shape: f32[16,32], index: 1, kind: input, shape index: {}]   ;;  %s2809_s2 = inlined_call_operand.hbm [shape: f32[8,32], index: 2, kind: input, shape index: {}]   ;;  %s2810_s3 = inlined_call_operand.vmem [shape: f32[2,32,96], index: 3, kind: input, shape index: {}]   ;;  %s2811_s4 = inlined_call_operand.vmem [shape: f32[2,1,96], index: 4, kind: input, shape index: {}]   ;;  %s2812_s5 = inlined_call_operand.vmem [shape: f32[2,32,32], index: 5, kind: input, shape index: {}]   ;;  %s2813_s6 = inlined_call_operand.vmem [shape: f32[2,1,32], index: 6, kind: input, shape index: {}]   ;;  %s2814_s7 = inlined_call_operand.vmem [shape: f32[2,32,64], index: 7, kind: input, shape index: {}]   ;;  %s2815_s8 = inlined_call_operand.hbm [shape: f32[2,1,64], index: 8, kind: input, shape index: {}]   ;;  %s2816_s9 = inlined_call_operand.vmem [shape: f32[2,64,32], index: 9, kind: input, shape index: {}]   ;;  %s2817_s10 = inlined_call_operand.vmem [shape: f32[2,1,32], index: 10, kind: input, shape index: {}]   ;;  %s2818_s11 = inlined_call_operand.vmem [shape: f32[2,1,32], index: 11, kind: input, shape index: {}]   ;;  %s2819_s12 = inlined_call_operand.vmem [shape: f32[2,1,32], index: 12, kind: input, shape index: {}]   ;;  %s2820_s13 = inlined_call_operand.hbm [shape: f32[2,1,32], index: 13, kind: input, shape index: {}]   ;;  %s2821_s14 = inlined_call_operand.hbm [shape: f32[2,1,32], index: 14, kind: input, shape index: {}]   ;;  %s2822_s15 = inlined_call_operand.hbm [shape: f32[2,8,32], index: 15, kind: output, shape index: {}]  }
   0x1   :  { %2838 = sst [smem:[#allocation19_spill]] %s2807_s0 }
   0x2   :  { %2839 = sst [smem:[#allocation20_spill]] %s2808_s1 }
   0x3   :  { %2840 = sst [smem:[#allocation21_spill]] %s2809_s2 }
   0x4   :  { %2841 = sst [smem:[#allocation22_spill]] %s2815_s8 }
   0x5   :  { %2842 = sst [smem:[#allocation23_spill]] %s2816_s9 }
   0x6   :  { %2843 = sst [smem:[#allocation24_spill]] %s2817_s10 }
   0x7   :  { %2844 = sst [smem:[#allocation25_spill]] %s2818_s11 }
   0x8   :  { %2845 = sst [smem:[#allocation26_spill]] %s2819_s12 }
   0x9   :  { %2846 = sst [smem:[#allocation27_spill]] %s2820_s13 }
   0xa   :  { %2847 = sst [smem:[#allocation28_spill]] %s2822_s15 }
   0xb   :  { %20 = vsyncpa [#allocation3], 0 }
   0xc   :  { %22 = vsyncpa [#allocation3 + $0x1], 0 }
   0xd   :  { %23 = vsyncpa [#allocation6], 0 }
   0xe   :  { %24 = vsyncpa [#allocation9], 0 }
   0xf   :  { %25 = vsyncpa [#allocation12], 0 }
  0x10   :  { %26 = vsyncpa [#allocation4], 0 }
  0x11   :  { %28 = vsyncpa [#allocation4 + $0x1], 0  ;;  %s2349_s18 = smov 0   ;;  %s2351_s19 = smov 0  }
  0x12   :  { %s2353_s20 = smov 0   ;;  %s2355_s21 = smov 0  }
  0x13 LB: > { %s2848_s1 = sld [smem:[#allocation20_spill]]  ;;  %s2373_s25 = sadd.s32 4294967295, %s2249_s21   ;;  %s2249_s21 = sphi %s2355_s21, %s2875_s21   ;;  %s2245_s20 = sphi %s2353_s20, %s2874_s20   ;;  %s2241_s19 = sphi %s2351_s19, %s2873_s19   ;;  %s2237_s18 = sphi %s2349_s18, %s2872_s18  }
  0x14   : > { %p1734_p0 = scmp.ge.s32.totalorder %s2249_s21, 1  ;;  %p55_p1 = scmp.eq.s32.totalorder %s2373_s25, 0 }
  0x15   : > { %p385_p2 = scmp.lt.s32.totalorder %s2249_s21, 3  ;;  %s2251_s27 = smov [#allocation5]  }
  0x16   : > { %s398_s28 = sshll.u32 %s2251_s27, 4  ;;  %s2850_s8 = sld [smem:[#allocation22_spill]]  ;;  %s399_s28 = int_to_ptr.vmem [resolvable:$true] %s398_s28 }
  0x17   : > { %p2378_p3 = pnand %p1734_p0, %p385_p2  ;;  %s2252_s22 = smov [#allocation8]  }
  0x18   : > { %s439_s23 = sshll.u32 %s2252_s22, 4  ;;  %s2253_s27 = smov 128   ;;  %s440_s23 = int_to_ptr.vmem [resolvable:$true] %s439_s23 }
  0x19   : > { %s396_s24 = sshll.u32 %s2848_s1, 4  ;;  %p1837_p4 = pneg %p2378_p3  ;;  %s397_s24 = int_to_ptr.hbm [resolvable:$true] %s396_s24 }
  0x1a   : > { %s2254_s1 = smov 8   ;;  %s2255_s15 = smov 16  }
  0x1b   : > { %p2390_p6 = pnand %p1837_p4, %p55_p1  ;;  %s2256_s29 = smov 1  }
  0x1c   : > { %s437_s16 = sshll.u32 %s2850_s8, 4  ;;  %s2852_s2 = sld [smem:[#allocation21_spill]]  ;;  %s438_s16 = int_to_ptr.hbm [resolvable:$true] %s437_s16 }
  0x1d   : > { %1840 = dma.hbm_to_vmem [thread:$0]  (!%p2390_p6), %s397_s24, 256, %s399_s28, [#allocation6], %s2253_s27, %s2253_s27, %s2254_s1  }
  0x1e   : > { %1846 = dma.hbm_to_vmem [thread:$0]  (!%p2390_p6), %s438_s16, 32, %s440_s23, [#allocation9], %s2255_s15, %s2255_s15, %s2256_s29  }
  0x1f   : > { %s2257_s12 = smov [#allocation7]   ;;  %s2853_s13 = sld [smem:[#allocation27_spill]] }
  0x20   : > { %s413_s11 = sshll.u32 %s2257_s12, 4  ;;  %s2258_s8 = smov [#allocation10]   ;;  %s414_s11 = int_to_ptr.vmem [resolvable:$true] %s413_s11 }
  0x21   : > { %s465_s24 = sshll.u32 %s2258_s8, 4  ;;  %s477_s12 = sshll.u32 %s2821_s14, 4  ;;  %s466_s24 = int_to_ptr.vmem [resolvable:$true] %s465_s24  ;;  %s478_s12 = int_to_ptr.hbm [resolvable:$true] %s477_s12 }
  0x22   : > { %s411_s10 = sshll.u32 %s2852_s2, 4  ;;  %s2259_s9 = smov [#allocation11]   ;;  %s412_s10 = int_to_ptr.hbm [resolvable:$true] %s411_s10 }
  0x23   : > { %1843 = dma.hbm_to_vmem [thread:$0]  (!%p2390_p6), %s412_s10, 128, %s414_s11, [#allocation6]  }
  0x24   : > { %s479_s10 = sshll.u32 %s2259_s9, 4  ;;  %s1733_s11 = sadd.s32 4294967294, %s2249_s21   ;;  %s480_s10 = int_to_ptr.vmem [resolvable:$true] %s479_s10 }
  0x25   : > { %s463_s1 = sshll.u32 %s2853_s13, 4  ;;  %s2415_s23 = sadd.s32 1, %s2249_s21   ;;  %s464_s1 = int_to_ptr.hbm [resolvable:$true] %s463_s1 }
  0x26   : > { %1849 = dma.hbm_to_vmem [thread:$0]  (!%p2390_p6), %s464_s1, 32, %s466_s24, [#allocation9], %s2255_s15, %s2255_s15, %s2256_s29  }
  0x27   : > { %1852 = dma.hbm_to_vmem [thread:$0]  (!%p2390_p6), %s478_s12, 32, %s480_s10, [#allocation12], %s2255_s15, %s2255_s15, %s2256_s29  }
  0x28   : > { %s41_s27 = sadd.s32 1, %s2245_s20  ;;  %s38_s30 = ssub.s32 %s2249_s21, %s2415_s23 }
  0x29   : > { %p48_p7 = scmp.ne.s32.totalorder %s2245_s20, %s2241_s19  ;;  %p39_p8 = scmp.eq.s32.totalorder %s38_s30, 0 }
  0x2a   : > { %p49_p9 = scmp.eq.s32.totalorder %s2249_s21, 0  ;;  %p54_p10 = scmp.ne.s32.totalorder %s2241_s19, %s2237_s18 }
  0x2b   : > { %p372_p11 = scmp.eq.s32.totalorder %s2373_s25, 1  ;;  %p378_p0 = scmp.eq.s32.totalorder %s1733_s11, 1 }
  0x2c   : > { %s2427_s22 = scalar_select %p39_p8, %s2245_s20, %s41_s27  }
  0x2d   : > { %p2431_p12 = por %p55_p1, %p54_p10  ;;  %p2435_p13 = por %p372_p11, %p48_p7 }
  0x2e   : > { %p50_p2 = por %p49_p9, %p48_p7  ;;  %s493_s29 = sand.u32 1, %s2245_s20  }
  0x2f   : > { %p2440_p4 = por %p378_p0, %p54_p10  ;;  %p1866_p6 = scmp.lt.s32.totalorder %s2249_s21, 2 }
  0x30   : > { %s1741_s8 = sshll.u32 %s493_s29, 3  ;;  %s1742_s24 = sshll.u32 %s2249_s21, 3 }
  0x31   : > { %s2857_s0 = sld [smem:[#allocation19_spill]]  ;;  %s497_s10 = scalar_lea.vmem [#allocation2], %s1741_s8 }
  0x32   : > { %s505_s27 = sshll.u32 %s497_s10, 4  ;;  %p2449_p8 = pnand %p1866_p6, %p50_p2  ;;  %s506_s27 = int_to_ptr.vmem [resolvable:$true] %s505_s27 }
  0x33   : > { %s494_s30 = scalar_lea.sflag [#allocation3], %s493_s29 }
  0x34   : > { %p2145_p9 = pneg %p2449_p8 }
  0x37   : > { %s501_s12 = scalar_lea.hbm %s2857_s0, %s1742_s24  ;;  %s2148_s8 = scalar_lea.hbm %s2857_s0, 16 }
  0x38   : > { %s503_s9 = sshll.u32 %s501_s12, 4  ;;  %s504_s9 = int_to_ptr.hbm [resolvable:$true] %s503_s9 }
  0x39   : > { %s2141_s2 = sshra.s32 %s504_s9, 4  ;;  %s2142_s2 = int_to_ptr.hbm [resolvable:$true] %s2141_s2 }
  0x3a   : > { %s2143_s13 = scalar_lea.hbm %s2142_s2, 8  ;;  %p2149_p0 = scmp.lt.s32.totalorder %s2142_s2, %s2857_s0 }
  0x3b   : > { %p2144_p7 = scmp.ne.s32.totalorder %s2142_s2, %s2143_s13  ;;  %p2150_p2 = scmp.lt.s32.totalorder %s2148_s8, %s2143_s13 }
  0x3d   : > { %p2146_p10 = pnand %p2145_p9, %p2144_p7  ;;  %p2151_p6 = por %p2150_p2, %p2149_p0 }
  0x3f   : > { %p2147_p11 = pneg %p2146_p10 }
  0x41   : > { %p2152_p5 = pnand %p2151_p6, %p2147_p11 }
  0x43   : > { %2155 = shalt.err (!%p2152_p5)
}
  0x44   : > { %1856 = dma.hbm_to_vmem [thread:$0]  (!%p2449_p8), %s504_s9, 128, %s506_s27, %s494_s30  }
  0x45   : > { %514 = sbr.rel (%p2378_p3) target bundleno = 4090 (0xffa), region = 80  ;;  %s2466_s29 = sand.u32 (!%p2378_p3), 1, %s2241_s19  }
  0x46   : > { %s2828_s10 = sshll.u32 (!%p2378_p3), %s2466_s29, 3  ;;  %s517_s24 = scalar_lea.sflag (!%p2378_p3), [#allocation3], %s2466_s29 }
  0x47   : > { %s520_s2 = scalar_lea.vmem (!%p2378_p3), [#allocation2], %s2828_s10 }
  0x4a   : > { %2216 = dma.done.wait (%p2431_p12), %s517_s24, 128  }
  0x4b   : > { %2218 = vsyncadd (%p2431_p12), %s517_s24, 4294967168 }
  0x4c   : > { %2220 = dma.done.wait (%p55_p1), [#allocation6], 384  }
  0x4d   : > { %2222 = vsyncadd (%p55_p1), [#allocation6], 4294966912 }
  0x4e   : > { %2224 = dma.done.wait (%p55_p1), [#allocation9], 64  }
  0x4f   : > { %2226 = vsyncadd (%p55_p1), [#allocation9], 4294967232 }
  0x50   : > { %2228 = dma.done.wait (%p55_p1), [#allocation12], 32  }
  0x51   : > { %2230 = vsyncadd (%p55_p1), [#allocation12], 4294967264  ;;  %v595_v0 = vld [vmem:[#allocation5 + $0x8] sm:$0xff]  ;;  %v594_v1 = vld [vmem:[#allocation5] sm:$0xff]  ;;  %vm597_vm0 = vcmask 130048   ;;  %vm629_vm1 = vcmask 261120  }
  0x52   : > { %615 = vmatpush.msra.mxu0 %v595_v0  ;;  %v593_v2 = vld [vmem:[%s520_s2] sm:$0xff]  ;;  %v624_v3 = vld [vmem:[%s2810_s3 + $0x18] sm:$0xff]  ;;  %v623_v4 = vld [vmem:[%s2810_s3 + $0x10] sm:$0xff]  ;;  %s2836_s12 = smov 112   ;;  %s2261_s24 = smov 104   ;;  %vm670_vm2 = vcmask 64512  }
  0x53   : > { %645 = vmatpush.msra.mxu1 %v624_v3  ;;  %v622_v5 = vld [vmem:[%s2810_s3 + $0x8] sm:$0xff]  ;;  %v621_v6 = vld [vmem:[%s2810_s3] sm:$0xff]  ;;  %s2834_s2 = smov 96   ;;  %s2263_s13 = smov 120   ;;  %vm935_vm3 = vcmask 195584   ;;  %vm1052_vm8 = vcmask 523264  }
  0x54   : > { %616 = vmatpush.msra.mxu0 %v594_v1  ;;  %v596_v7 = vld [vmem:[#allocation7] sm:$0xff]  ;;  %s2832_s26 = smov 64   ;;  %s2829_s17 = smov 8  }
  0x55   : > { %1751 = vmatmul.msk.f32.vlgmr.msra.gmra.mxu0 %vm597_vm0, %v593_v2  ;;  %646 = vmatpush.msra.mxu1 %v623_v4  ;;  %v1933_v10 = vld [vmem:[%s2811_s4] ss:$0 sm:$0xff]  ;;  %s2830_s9 = smov 16   ;;  %s2831_s27 = smov 24  }
  0x56   : > { %s2860_s11 = sld [smem:[#allocation25_spill]]  ;;  %s2868_s10 = smov 24  }
  0x57   : > { %647 = vmatpush.msra.mxu1 %v622_v5  ;;  %s2861_s28 = sld [smem:[#allocation26_spill]] }
  0x58   : > { %s2862_s8 = sld [smem:[#allocation24_spill]] }
  0x59   : > { %648 = vmatpush.msra.mxu1 %v621_v6  ;;  %s2869_s16 = sld [smem:[#allocation28_spill]] }
  0xd2   : > { %v618_v8 = vpop.f32.mrf.mxu0 }
  0xd3   : > { %v2501_v9 = vadd.f32 %v618_v8, %v596_v7 }
  0xd5   : > { %1752 = vmatmul.msk.f32.vlgmr.msra.gmra.mxu1 %vm629_vm1, %v2501_v9 }
 0x152   : > { %v650_v11 = vpop.f32.mrf.mxu1 }
 0x153   : > { %v2508_v12 = vadd.f32 %v1933_v10, %v650_v11  ;;  %v940_v10 = vld [vmem:[%s2812_s5 + $0x18] sm:$0xff]  ;;  %v939_v11 = vld [vmem:[%s2812_s5 + $0x10] sm:$0xff] }
 0x155   : > { %664 = vrot.lane.b32.xlu1 %v2508_v12, %s2836_s12  ;;  %666 = vrot.lane.b32.xlu0 %v2508_v12, %s2261_s24  ;;  %v653_v13 = vmul.f32 0.35355338, %v2508_v12 }
 0x15d   : > { %668 = vrot.lane.b32.xlu1 %v2508_v12, %s2834_s2  ;;  %662 = vrot.lane.b32.xlu0 %v2508_v12, %s2263_s13 }
 0x165   : > { %655 = vrot.lane.b32.xlu1 %v653_v13, %s2263_s13 }
 0x1c7   : > { %v2520_v14 = vpop.permute.xlu1 %664  ;;  %v667_v15 = vpop.permute.xlu0 %666 }
 0x1c8   : > { %747 = vrot.lane.b32.xlu2 %v667_v15, %s2834_s2 }
 0x1cf   : > { %v669_v16 = vpop.permute.xlu1 %668  ;;  %v663_v17 = vpop.permute.xlu0 %662 }
 0x1d0   : > { %1753 = vmatpush.xpose.msk.msra.mxu3 %vm670_vm2, %v669_v16  ;;  %695 = vrot.lane.b32.xlu0 %v663_v17, %s2834_s2  ;;  %v1923_v46 = vpack.i.bf16 %v663_v17, %v667_v15 }
 0x1d1   : > { %659 = vrot.lane.b32.xlu2 %v653_v13, %s2261_s24 }
 0x1d3   : > { %1754 = vmatmul.msk.f32.vlgmr.msra.gmra.mxu3 %vm670_vm2, %v653_v13 }
 0x1d7   : > { %v656_v22 = vpop.permute.xlu1 %655 }
 0x1d8   : > { %657 = vrot.lane.b32.xlu0 %v653_v13, %s2836_s12  ;;  %v937_v13 = vld [vmem:[%s2812_s5] sm:$0xff]  ;;  %s2191_s12 = scalar_lea.hbm %s2869_s16, 16 }
 0x1d9   : > { %721 = vrot.lane.b32.xlu2 %v2520_v14, %s2834_s2  ;;  %s2867_s2 = smov 8  }
 0x222   : > { %v748_v18 = vpop.permute.xlu2 %747 }
 0x223   : > { %1759 = vmatpush.xpose.msk.msra.mxu2 %vm670_vm2, %v748_v18 }
 0x22b   : > { %v660_v19 = vpop.permute.xlu2 %659 }
 0x22c   : > { %1760 = vmatmul.msk.f32.vlgmr.msra.gmra.mxu2 %vm670_vm2, %v660_v19 }
 0x233   : > { %v722_v20 = vpop.permute.xlu2 %721 }
 0x234   : > { %1757 = vmatpush.xpose.msk.msrb.mxu0 %vm670_vm2, %v722_v20 }
 0x242   : > { %v696_v21 = vpop.permute.xlu0 %695 }
 0x243   : > { %1755 = vmatpush.xpose.msk.msrb.mxu3 %vm670_vm2, %v696_v21  ;;  %v1934_v21 = vld [vmem:[%s2813_s6] ss:$0 sm:$0xff] }
 0x246   : > { %1756 = vmatmul.msk.f32.vlgmr.msrb.gmra.mxu3 %vm670_vm2, %v656_v22 }
 0x24a   : > { %v658_v23 = vpop.permute.xlu0 %657 }
 0x24b   : > { %1758 = vmatmul.msk.f32.vlgmr.msrb.gmra.mxu0 %vm670_vm2, %v658_v23 }
 0x256   : > { %v692_v26 = vpop.f32.mrf.mxu3 }
 0x257   : > { %v773_v31 = vsel %vm670_vm2, %v692_v26, -inf }
 0x2af   : > { %v770_v24 = vpop.f32.mrf.mxu2 }
 0x2b0   : > { %v782_v25 = vsel %vm670_vm2, %v770_v24, -inf }
 0x2b1   : > { %783 = vmax.xlane.f32.xlu1 %v782_v25 }
 0x2c8   : > { %v744_v27 = vpop.f32.mrf.mxu0 }
 0x2c9   : > { %v718_v28 = vpop.f32.mrf.mxu3  ;;  %v779_v29 = vsel %vm670_vm2, %v744_v27, -inf }
 0x2ca   : > { %780 = vmax.xlane.f32.xlu0 %v779_v29  ;;  %v776_v30 = vsel %vm670_vm2, %v718_v28, -inf }
 0x2cb   : > { %777 = vmax.xlane.f32.xlu2 %v776_v30 }
 0x2d3   : > { %774 = vmax.xlane.f32.xlu2 %v773_v31 }
 0x324   : > { %v784_v32 = vpop.xlane.xlu1 %783 }
 0x325   : > { %v788_v33 = vsub.f32 %v770_v24, %v784_v32 }
 0x327   : > { %v795_v34 = vmul.f32 1.442695, %v788_v33 }
 0x329   : > { %1949 = vpow2.f32 %v795_v34 }
 0x32f   : > { %v1950_v35 = vpop.eup %1949 }
 0x330   : > { %v806_v36 = vsel %vm670_vm2, %v1950_v35, 0.0 }
 0x331   : > { %807 = vadd.xlane.f32.xlu1 %v806_v36 }
 0x33d   : > { %v781_v37 = vpop.xlane.xlu0 %780 }
 0x33e   : > { %v787_v38 = vsub.f32 %v744_v27, %v781_v37  ;;  %v778_v39 = vpop.xlane.xlu2 %777  ;;  %v1011_v37 = vld [vmem:[%s2814_s7 + $0x18] sm:$0xff] }
 0x33f   : > { %v786_v40 = vsub.f32 %v718_v28, %v778_v39  ;;  %v1009_v39 = vld [vmem:[%s2814_s7 + $0x8] sm:$0xff] }
 0x340   : > { %v793_v41 = vmul.f32 1.442695, %v787_v38  ;;  %v1010_v38 = vld [vmem:[%s2814_s7 + $0x10] sm:$0xff] }
 0x341   : > { %v791_v42 = vmul.f32 1.442695, %v786_v40  ;;  %v1008_v40 = vld [vmem:[%s2814_s7] sm:$0xff] }
 0x342   : > { %1951 = vpow2.f32 %v793_v41 }
 0x343   : > { %1953 = vpow2.f32 %v791_v42 }
 0x346   : > { %v775_v43 = vpop.xlane.xlu2 %774 }
 0x347   : > { %v785_v44 = vsub.f32 %v692_v26, %v775_v43  ;;  %v2268_v26 = vmov 32.0  }
 0x348   : > { %v1952_v45 = vpop.eup %1951 }
 0x349   : > { %v1954_v47 = vpop.eup %1953  ;;  %v789_v48 = vmul.f32 1.442695, %v785_v44  ;;  %v803_v49 = vsel %vm670_vm2, %v1952_v45, 0.0 }
 0x34a   : > { %1924 = vrot.lane.b32.xlu1 %v1923_v46, %s2832_s26  ;;  %804 = vadd.xlane.f32.xlu0 %v803_v49  ;;  %v800_v50 = vsel %vm670_vm2, %v1954_v47, 0.0 }
 0x34b   : > { %1955 = vpow2.f32 %v789_v48  ;;  %801 = vadd.xlane.f32.xlu2 %v800_v50 }
 0x351   : > { %v1956_v51 = vpop.eup %1955 }
 0x352   : > { %v797_v52 = vsel %vm670_vm2, %v1956_v51, 0.0 }
 0x353   : > { %798 = vadd.xlane.f32.xlu0 %v797_v52 }
 0x363   : > { %869 = vrot.lane.b32.xlu2 %v2520_v14, %s2832_s26 }
 0x367   : > { %817 = vrot.lane.b32.xlu0 %v2508_v12, %s2832_s26  ;;  %v938_v12 = vld [vmem:[%s2812_s5 + $0x8] sm:$0xff]  ;;  %s2863_s26 = smov 112  }
 0x3a4   : > { %v808_v53 = vpop.xlane.xlu1 %807 }
 0x3a5   : > { %1957 = vrcp.f32 %v808_v53 }
 0x3ab   : > { %v1958_v54 = vpop.eup %1957 }
 0x3ac   : > { %v816_v60 = vmul.f32 %v1958_v54, %v1950_v35 }
 0x3bc   : > { %v1925_v55 = vpop.permute.xlu1 %1924 }
 0x3bd   : > { %v805_v56 = vpop.xlane.xlu0 %804  ;;  %v1927_v57 = vunpack.i.h.bf16 %v1925_v55  ;;  %v1926_v58 = vunpack.i.l.bf16 %v1925_v55  ;;  %v1935_v55 = vld [vmem:[%s2860_s11] ss:$0 sm:$0xff] }
 0x3be   : > { %1959 = vrcp.f32 %v805_v56  ;;  %v802_v59 = vpop.xlane.xlu2 %801 }
 0x3bf   : > { %864 = vmatpush.msrb.mxu1 %v1927_v57  ;;  %916 = vmatpush.msrb.mxu2 %v1926_v58  ;;  %1961 = vrcp.f32 %v802_v59  ;;  %v1936_v58 = vld [vmem:[%s2861_s28] ss:$0 sm:$0xff] }
 0x3c0   : > { %1764 = vmatmul.msk.f32.vlgmr.msrb.gmra.mxu2 %vm670_vm2, %v816_v60 }
 0x3c1   : > { %1031 = vmatpush.msra.mxu1 %v1011_v37 }
 0x3c3   : > { %1032 = vmatpush.msra.mxu1 %v1010_v38 }
 0x3c4   : > { %v1960_v61 = vpop.eup %1959 }
 0x3c5   : > { %v1962_v62 = vpop.eup %1961  ;;  %v815_v63 = vmul.f32 %v1960_v61, %v1952_v45  ;;  %1033 = vmatpush.msra.mxu1 %v1009_v39 }
 0x3c6   : > { %v870_v0 = vpop.permute.xlu2 %869  ;;  %v814_v1 = vmul.f32 %v1962_v62, %v1954_v47  ;;  %v799_v2 = vpop.xlane.xlu0 %798 }
 0x3c7   : > { %890 = vmatpush.msra.mxu0 %v870_v0  ;;  %1963 = vrcp.f32 %v799_v2  ;;  %1034 = vmatpush.msra.mxu1 %v1008_v40  ;;  %v1937_v0 = vld [vmem:[#allocation8] ss:$0 sm:$0xff] }
 0x3c8   : > { %1762 = vmatmul.msk.f32.vlgmr.msrb.gmra.mxu1 %vm670_vm2, %v814_v1  ;;  %1763 = vmatmul.msk.f32.vlgmr.msra.gmra.mxu0 %vm670_vm2, %v815_v63  ;;  %1965 = vrcp.f32 %v2268_v26 }
 0x3cd   : > { %v1964_v3 = vpop.eup %1963 }
 0x3ce   : > { %v813_v4 = vmul.f32 %v1964_v3, %v1956_v51  ;;  %v1966_v27 = vpop.eup %1965 }
 0x3cf   : > { %v975_v28 = vmul.f32 32.0, %v1966_v27  ;;  %vm979_vm4 = vweird.f32 %v1966_v27 }
 0x3d1   : > { %v976_v29 = vsub.f32 1.0, %v975_v28  ;;  %v1939_v28 = vld [vmem:[#allocation10] ss:$0 sm:$0xff] }
 0x3d3   : > { %v977_v30 = vmul.f32 %v1966_v27, %v976_v29 }
 0x3d5   : > { %v978_v31 = vadd.f32 %v1966_v27, %v977_v30 }
 0x3d7   : > { %v2577_v32 = vsel %vm979_vm4, %v1966_v27, %v978_v31  ;;  %v1940_v31 = vld [vmem:[#allocation11] ss:$0 sm:$0xff] }
 0x3d9   : > { %v818_v5 = vpop.permute.xlu0 %817 }
 0x3da   : > { %838 = vmatpush.msra.mxu3 %v818_v5 }
 0x3db   : > { %1761 = vmatmul.msk.f32.vlgmr.msra.gmra.mxu3 %vm670_vm2, %v813_v4  ;;  %v1938_v4 = vld [vmem:[%s2862_s8] ss:$0 sm:$0xff] }
 0x3dc   : > { %960 = vmatpush.msrb.mxu3 %v940_v10 }
 0x3de   : > { %961 = vmatpush.msrb.mxu3 %v939_v11 }
 0x3e0   : > { %962 = vmatpush.msrb.mxu3 %v938_v12 }
 0x3e2   : > { %963 = vmatpush.msrb.mxu3 %v937_v13 }
 0x443   : > { %v918_v8 = vpop.f32.mrf.mxu2 }
 0x445   : > { %v866_v6 = vpop.f32.mrf.mxu1  ;;  %v892_v7 = vpop.f32.mrf.mxu0 }
 0x446   : > { %922 = vrot.lane.b32.xlu1 %v866_v6, %s2829_s17  ;;  %926 = vrot.lane.b32.xlu2 %v892_v7, %s2830_s9  ;;  %s2859_s17 = sld [smem:[#allocation23_spill]]  ;;  %s1810_s9 = sshll.u32 %s2373_s25, 3 }
 0x447   : > { %s1600_s25 = scalar_lea.sflag [#allocation4], %s2466_s29 }
 0x44c   : > { %v1047_v41 = vld [vmem:[%s2859_s17 + $0x38] sm:$0xff]  ;;  %v1046_v42 = vld [vmem:[%s2859_s17 + $0x30] sm:$0xff]  ;;  %v1045_v43 = vld [vmem:[%s2859_s17 + $0x28] sm:$0xff] }
 0x44d   : > { %1064 = vmatpush.msrb.mxu0 %v1047_v41  ;;  %v1044_v46 = vld [vmem:[%s2859_s17 + $0x20] sm:$0xff]  ;;  %v1043_v48 = vld [vmem:[%s2859_s17 + $0x18] sm:$0xff]  ;;  %v1042_v61 = vld [vmem:[%s2859_s17 + $0x10] sm:$0xff] }
 0x44e   : > { %930 = vrot.lane.b32.xlu1 %v918_v8, %s2831_s27  ;;  %v1041_v62 = vld [vmem:[%s2859_s17 + $0x8] sm:$0xff]  ;;  %v1040_v63 = vld [vmem:[%s2859_s17] sm:$0xff]  ;;  %s2864_s27 = smov 96  }
 0x44f   : > { %1065 = vmatpush.msrb.mxu0 %v1046_v42 }
 0x451   : > { %1066 = vmatpush.msrb.mxu0 %v1045_v43 }
 0x453   : > { %1067 = vmatpush.msrb.mxu0 %v1044_v46 }
 0x455   : > { %1068 = vmatpush.msrb.mxu0 %v1043_v48 }
 0x457   : > { %1069 = vmatpush.msrb.mxu0 %v1042_v61 }
 0x459   : > { %1070 = vmatpush.msrb.mxu0 %v1041_v62 }
 0x45b   : > { %1071 = vmatpush.msrb.mxu0 %v1040_v63 }
 0x45e   : > { %v840_v15 = vpop.f32.mrf.mxu3 }
 0x4a0   : > { %v927_v17 = vpop.permute.xlu2 %926 }
 0x4b8   : > { %v923_v14 = vpop.permute.xlu1 %922 }
 0x4b9   : > { %v933_v16 = vsel %vm670_vm2, %v840_v15, %v923_v14  ;;  %v1771_v15 = vld [vmem:[%s2810_s3 + $0x38] sm:$0xff] }
 0x4ba   : > { %v934_v19 = vsel %vm597_vm0, %v933_v16, %v927_v17  ;;  %1134 = vmatpush.msra.mxu2 %v1771_v15  ;;  %v1770_v16 = vld [vmem:[%s2810_s3 + $0x30] sm:$0xff]  ;;  %v1769_v17 = vld [vmem:[%s2810_s3 + $0x28] sm:$0xff] }
 0x4bc   : > { %1135 = vmatpush.msra.mxu2 %v1770_v16 }
 0x4be   : > { %1136 = vmatpush.msra.mxu2 %v1769_v17 }
 0x4c0   : > { %v931_v18 = vpop.permute.xlu1 %930 }
 0x4c1   : > { %v936_v20 = vsel %vm935_vm3, %v934_v19, %v931_v18  ;;  %v1768_v18 = vld [vmem:[%s2810_s3 + $0x20] sm:$0xff] }
 0x4c2   : > { %1765 = vmatmul.msk.f32.vlgmr.msrb.gmra.mxu3 %vm629_vm1, %v936_v20  ;;  %1137 = vmatpush.msra.mxu2 %v1768_v18 }
 0x545   : > { %v965_v22 = vpop.f32.mrf.mxu3 }
 0x546   : > { %v966_v23 = vadd.f32 %v1934_v21, %v965_v22 }
 0x548   : > { %v968_v24 = vadd.f32 %v966_v23, %v2501_v9 }
 0x54a   : > { %v971_v25 = vsel %vm629_vm1, %v968_v24, 0.0 }
 0x54b   : > { %972 = vadd.xlane.f32.xlu0 %v971_v25 }
 0x5be   : > { %v973_v33 = vpop.xlane.xlu0 %972 }
 0x5bf   : > { %v981_v34 = vmul.f32 %v2577_v32, %v973_v33 }
 0x5c1   : > { %v982_v35 = vsub.f32 %v968_v24, %v981_v34 }
 0x5c3   : > { %v983_v36 = vmul.f32 %v982_v35, %v982_v35 }
 0x5c5   : > { %v984_v9 = vsel %vm629_vm1, %v983_v36, 0.0 }
 0x5c6   : > { %985 = vadd.xlane.f32.xlu2 %v984_v9 }
 0x639   : > { %v986_v44 = vpop.xlane.xlu2 %985 }
 0x63a   : > { %v987_v45 = vmul.f32 %v986_v44, %v2577_v32 }
 0x63c   : > { %v988_v47 = vadd.f32 1e-05, %v987_v45 }
 0x63e   : > { %1967 = vrsqrt.f32 %v988_v47  ;;  %vm995_vm6 = vweird.f32 %v988_v47 }
 0x644   : > { %v1968_v49 = vpop.eup %1967 }
 0x645   : > { %v990_v50 = vmul.f32 %v1968_v49, %v988_v47  ;;  %vm996_vm5 = vweird.f32 %v1968_v49 }
 0x646   : > { %vm997_vm7 = vmor %vm995_vm6, %vm996_vm5 }
 0x647   : > { %v991_v51 = vmul.f32 %v1968_v49, %v990_v50 }
 0x649   : > { %v992_v52 = vmul.f32 0.5, %v991_v51 }
 0x64b   : > { %v993_v53 = vsub.f32 1.5, %v992_v52 }
 0x64d   : > { %v994_v54 = vmul.f32 %v1968_v49, %v993_v53 }
 0x64f   : > { %v998_v56 = vsel %vm997_vm7, %v1968_v49, %v994_v54 }
 0x650   : > { %v999_v57 = vmul.f32 %v998_v56, %v982_v35  ;;  %v1941_v35 = vld [vmem:[%s2811_s4 + $0x1] ss:$0 sm:$0xff] }
 0x652   : > { %v1003_v59 = vmul.f32 %v1935_v55, %v999_v57 }
 0x654   : > { %v1007_v60 = vadd.f32 %v1936_v58, %v1003_v59 }
 0x656   : > { %1766 = vmatmul.msk.f32.vlgmr.msra.gmra.mxu1 %vm629_vm1, %v1007_v60 }
 0x6d3   : > { %v1036_v1 = vpop.f32.mrf.mxu1 }
 0x6d4   : > { %v1037_v2 = vadd.f32 %v1937_v0, %v1036_v1 }
 0x6d6   : > { %v1039_v3 = vmax.f32 %v1037_v2, 0.0 }
 0x6d8   : > { %1767 = vmatmul.msk.f32.vlgmr.msrb.gmra.mxu0 %vm1052_vm8, %v1039_v3 }
 0x755   : > { %v1073_v5 = vpop.f32.mrf.mxu0 }
 0x756   : > { %v1074_v6 = vadd.f32 %v1938_v4, %v1073_v5 }
 0x758   : > { %v1076_v7 = vadd.f32 %v1074_v6, %v1007_v60 }
 0x75a   : > { %v1079_v8 = vsel %vm629_vm1, %v1076_v7, 0.0 }
 0x75b   : > { %1080 = vadd.xlane.f32.xlu1 %v1079_v8 }
 0x7ce   : > { %v1081_v10 = vpop.xlane.xlu1 %1080 }
 0x7cf   : > { %v1082_v11 = vmul.f32 %v1081_v10, %v2577_v32 }
 0x7d1   : > { %v1083_v12 = vsub.f32 %v1076_v7, %v1082_v11 }
 0x7d3   : > { %v1084_v13 = vmul.f32 %v1083_v12, %v1083_v12 }
 0x7d5   : > { %v1085_v14 = vsel %vm629_vm1, %v1084_v13, 0.0 }
 0x7d6   : > { %1086 = vadd.xlane.f32.xlu0 %v1085_v14 }
 0x849   : > { %v1087_v19 = vpop.xlane.xlu0 %1086 }
 0x84a   : > { %v1088_v20 = vmul.f32 %v1087_v19, %v2577_v32 }
 0x84c   : > { %v1089_v21 = vadd.f32 1e-05, %v1088_v20 }
 0x84e   : > { %1969 = vrsqrt.f32 %v1089_v21  ;;  %vm1096_vm10 = vweird.f32 %v1089_v21 }
 0x854   : > { %v1970_v22 = vpop.eup %1969 }
 0x855   : > { %v1091_v23 = vmul.f32 %v1970_v22, %v1089_v21  ;;  %vm1097_vm9 = vweird.f32 %v1970_v22 }
 0x856   : > { %vm1098_vm11 = vmor %vm1096_vm10, %vm1097_vm9 }
 0x857   : > { %v1092_v24 = vmul.f32 %v1970_v22, %v1091_v23 }
 0x859   : > { %v1093_v25 = vmul.f32 0.5, %v1092_v24 }
 0x85b   : > { %v1094_v26 = vsub.f32 1.5, %v1093_v25 }
 0x85d   : > { %v1095_v27 = vmul.f32 %v1970_v22, %v1094_v26 }
 0x85f   : > { %v1099_v29 = vsel %vm1098_vm11, %v1970_v22, %v1095_v27 }
 0x860   : > { %v1100_v30 = vmul.f32 %v1099_v29, %v1083_v12 }
 0x862   : > { %v1104_v33 = vmul.f32 %v1939_v28, %v1100_v30 }
 0x864   : > { %v2645_v34 = vadd.f32 %v1940_v31, %v1104_v33 }
 0x866   : > { %1773 = vmatmul.msk.f32.vlgmr.msra.gmra.mxu2 %vm629_vm1, %v2645_v34 }
 0x8e9   : > { %v1139_v36 = vpop.f32.mrf.mxu2 }
 0x8ea   : > { %v2652_v9 = vadd.f32 %v1941_v35, %v1139_v36  ;;  %v1789_v36 = vld [vmem:[%s2812_s5 + $0x38] sm:$0xff] }
 0x8ec   : > { %1151 = vrot.lane.b32.xlu0 %v2652_v9, %s2263_s13  ;;  %1155 = vrot.lane.b32.xlu1 %v2652_v9, %s2261_s24  ;;  %v1142_v37 = vmul.f32 0.35355338, %v2652_v9 }
 0x8ed   : > { %1153 = vrot.lane.b32.xlu2 %v2652_v9, %s2863_s26 }
 0x8f5   : > { %1157 = vrot.lane.b32.xlu2 %v2652_v9, %s2864_s27 }
 0x8fd   : > { %1146 = vrot.lane.b32.xlu2 %v1142_v37, %s2863_s26  ;;  %s1610_s26 = scalar_lea.hbm %s2869_s16, %s1810_s9 }
 0x905   : > { %1144 = vrot.lane.b32.xlu2 %v1142_v37, %s2263_s13  ;;  %s2866_s13 = smov 16  }
 0x947   : > { %v1154_v38 = vpop.permute.xlu2 %1153 }
 0x948   : > { %1209 = vrot.lane.b32.xlu0 %v1154_v38, %s2864_s27 }
 0x94f   : > { %v1158_v39 = vpop.permute.xlu2 %1157 }
 0x950   : > { %1774 = vmatpush.xpose.msk.msra.mxu3 %vm670_vm2, %v1158_v39  ;;  %1148 = vrot.lane.b32.xlu0 %v1142_v37, %s2261_s24  ;;  %s2865_s24 = smov 64  }
 0x953   : > { %1775 = vmatmul.msk.f32.vlgmr.msra.gmra.mxu3 %vm670_vm2, %v1142_v37  ;;  %v1787_v37 = vld [vmem:[%s2812_s5 + $0x28] sm:$0xff] }
 0x957   : > { %v1147_v43 = vpop.permute.xlu2 %1146 }
 0x95e   : > { %v1156_v40 = vpop.permute.xlu1 %1155  ;;  %v1152_v41 = vpop.permute.xlu0 %1151 }
 0x95f   : > { %1235 = vrot.lane.b32.xlu1 %v1156_v40, %s2864_s27  ;;  %v1145_v47 = vpop.permute.xlu2 %1144  ;;  %v1928_v10 = vpack.i.bf16 %v1156_v40, %v1154_v38  ;;  %v1786_v38 = vld [vmem:[%s2812_s5 + $0x20] sm:$0xff] }
 0x967   : > { %1183 = vrot.lane.b32.xlu1 %v1152_v41, %s2864_s27  ;;  %s2870_s27 = sshll.u32 %s2466_s29, 3 }
 0x9ba   : > { %v1210_v42 = vpop.permute.xlu0 %1209 }
 0x9bb   : > { %1778 = vmatpush.xpose.msk.msrb.mxu2 %vm670_vm2, %v1210_v42 }
 0x9be   : > { %1779 = vmatmul.msk.f32.vlgmr.msrb.gmra.mxu2 %vm670_vm2, %v1147_v43 }
 0x9c2   : > { %v1149_v45 = vpop.permute.xlu0 %1148 }
 0x9d1   : > { %v1236_v44 = vpop.permute.xlu1 %1235 }
 0x9d2   : > { %1780 = vmatpush.xpose.msk.msrb.mxu3 %vm670_vm2, %v1236_v44 }
 0x9d5   : > { %1781 = vmatmul.msk.f32.vlgmr.msrb.gmra.mxu3 %vm670_vm2, %v1149_v45 }
 0x9d6   : > { %v1180_v50 = vpop.f32.mrf.mxu3 }
 0x9d7   : > { %v1261_v51 = vsel %vm670_vm2, %v1180_v50, -inf }
 0x9d9   : > { %v1184_v46 = vpop.permute.xlu1 %1183 }
 0x9da   : > { %1776 = vmatpush.xpose.msk.msrb.mxu1 %vm670_vm2, %v1184_v46  ;;  %v1942_v46 = vld [vmem:[%s2813_s6 + $0x1] ss:$0 sm:$0xff] }
 0x9dd   : > { %1777 = vmatmul.msk.f32.vlgmr.msrb.gmra.mxu1 %vm670_vm2, %v1145_v47 }
 0xa41   : > { %v1232_v48 = vpop.f32.mrf.mxu2 }
 0xa42   : > { %v1267_v49 = vsel %vm670_vm2, %v1232_v48, -inf }
 0xa43   : > { %1268 = vmax.xlane.f32.xlu0 %v1267_v49 }
 0xa4b   : > { %1262 = vmax.xlane.f32.xlu0 %v1261_v51 }
 0xa58   : > { %v1258_v52 = vpop.f32.mrf.mxu3 }
 0xa59   : > { %v1270_v53 = vsel %vm670_vm2, %v1258_v52, -inf }
 0xa5a   : > { %v1206_v54 = vpop.f32.mrf.mxu1  ;;  %1271 = vmax.xlane.f32.xlu1 %v1270_v53 }
 0xa5b   : > { %v1264_v55 = vsel %vm670_vm2, %v1206_v54, -inf }
 0xa5c   : > { %1265 = vmax.xlane.f32.xlu2 %v1264_v55 }
 0xab6   : > { %v1269_v56 = vpop.xlane.xlu0 %1268 }
 0xab7   : > { %v1275_v57 = vsub.f32 %v1232_v48, %v1269_v56  ;;  %v1797_v56 = vld [vmem:[%s2814_s7 + $0x38] sm:$0xff] }
 0xab9   : > { %v1281_v58 = vmul.f32 1.442695, %v1275_v57  ;;  %v1795_v57 = vld [vmem:[%s2814_s7 + $0x28] sm:$0xff] }
 0xabb   : > { %1971 = vpow2.f32 %v1281_v58  ;;  %v1794_v58 = vld [vmem:[%s2814_s7 + $0x20] sm:$0xff] }
 0xabe   : > { %v1263_v63 = vpop.xlane.xlu0 %1262 }
 0xabf   : > { %v1273_v3 = vsub.f32 %v1180_v50, %v1263_v63 }
 0xac1   : > { %v1972_v59 = vpop.eup %1971  ;;  %v1277_v5 = vmul.f32 1.442695, %v1273_v3 }
 0xac2   : > { %v1291_v60 = vsel %vm670_vm2, %v1972_v59, 0.0 }
 0xac3   : > { %1292 = vadd.xlane.f32.xlu1 %v1291_v60  ;;  %v1805_v60 = vld [vmem:[%s2859_s17 + $0x70] sm:$0xff] }
 0xacd   : > { %v1272_v61 = vpop.xlane.xlu1 %1271 }
 0xace   : > { %v1276_v62 = vsub.f32 %v1258_v52, %v1272_v61  ;;  %v1804_v61 = vld [vmem:[%s2859_s17 + $0x68] sm:$0xff] }
 0xacf   : > { %v1266_v0 = vpop.xlane.xlu2 %1265 }
 0xad0   : > { %v1283_v1 = vmul.f32 1.442695, %v1276_v62  ;;  %v1274_v2 = vsub.f32 %v1206_v54, %v1266_v0  ;;  %v1803_v0 = vld [vmem:[%s2859_s17 + $0x60] sm:$0xff] }
 0xad2   : > { %1973 = vpow2.f32 %v1283_v1  ;;  %v1279_v4 = vmul.f32 1.442695, %v1274_v2  ;;  %v1802_v2 = vld [vmem:[%s2859_s17 + $0x58] sm:$0xff] }
 0xad4   : > { %1975 = vpow2.f32 %v1279_v4 }
 0xad5   : > { %1977 = vpow2.f32 %v1277_v5 }
 0xad8   : > { %v1974_v6 = vpop.eup %1973 }
 0xad9   : > { %v1294_v7 = vsel %vm670_vm2, %v1974_v6, 0.0 }
 0xada   : > { %v1976_v8 = vpop.eup %1975  ;;  %1295 = vadd.xlane.f32.xlu2 %v1294_v7 }
 0xadb   : > { %v1288_v11 = vsel %vm670_vm2, %v1976_v8, 0.0  ;;  %v1978_v12 = vpop.eup %1977 }
 0xadc   : > { %1929 = vrot.lane.b32.xlu1 %v1928_v10, %s2865_s24  ;;  %1289 = vadd.xlane.f32.xlu0 %v1288_v11  ;;  %v1285_v13 = vsel %vm670_vm2, %v1978_v12, 0.0  ;;  %v1943_v10 = vld [vmem:[%s2860_s11 + $0x1] ss:$0 sm:$0xff] }
 0xae4   : > { %1286 = vadd.xlane.f32.xlu0 %v1285_v13  ;;  %v1944_v13 = vld [vmem:[%s2861_s28 + $0x1] ss:$0 sm:$0xff] }
 0xaf2   : > { %1331 = vrot.lane.b32.xlu2 %v1152_v41, %s2865_s24 }
 0xaf8   : > { %1305 = vrot.lane.b32.xlu0 %v2652_v9, %s2865_s24  ;;  %v1788_v9 = vld [vmem:[%s2812_s5 + $0x30] sm:$0xff]  ;;  %s592_s24 = scalar_lea.vmem [#allocation13], %s2870_s27 }
 0xb36   : > { %v1293_v14 = vpop.xlane.xlu1 %1292 }
 0xb37   : > { %1979 = vrcp.f32 %v1293_v14 }
 0xb3d   : > { %v1980_v15 = vpop.eup %1979 }
 0xb3e   : > { %v1303_v21 = vmul.f32 %v1980_v15, %v1972_v59  ;;  %v1806_v59 = vld [vmem:[%s2859_s17 + $0x78] sm:$0xff] }
 0xb4d   : > { %v1296_v16 = vpop.xlane.xlu2 %1295 }
 0xb4e   : > { %1981 = vrcp.f32 %v1296_v16  ;;  %v1930_v17 = vpop.permute.xlu1 %1929  ;;  %v1801_v16 = vld [vmem:[%s2859_s17 + $0x50] sm:$0xff] }
 0xb4f   : > { %v1932_v18 = vunpack.i.h.bf16 %v1930_v17  ;;  %v1931_v19 = vunpack.i.l.bf16 %v1930_v17  ;;  %v1290_v20 = vpop.xlane.xlu0 %1289  ;;  %v1800_v17 = vld [vmem:[%s2859_s17 + $0x48] sm:$0xff] }
 0xb50   : > { %1983 = vrcp.f32 %v1290_v20 }
 0xb51   : > { %1378 = vmatpush.msra.mxu2 %v1931_v19  ;;  %1404 = vmatpush.msra.mxu3 %v1932_v18  ;;  %v1799_v18 = vld [vmem:[%s2859_s17 + $0x40] sm:$0xff]  ;;  %v1945_v19 = vld [vmem:[#allocation8 + $0x1] ss:$0 sm:$0xff] }
 0xb52   : > { %1784 = vmatmul.msk.f32.vlgmr.msra.gmra.mxu2 %vm670_vm2, %v1303_v21 }
 0xb53   : > { %1551 = vmatpush.msrb.mxu2 %v1806_v59 }
 0xb54   : > { %v1982_v22 = vpop.eup %1981 }
 0xb55   : > { %v1304_v23 = vmul.f32 %v1982_v22, %v1974_v6  ;;  %v1332_v24 = vpop.permute.xlu2 %1331  ;;  %1552 = vmatpush.msrb.mxu2 %v1805_v60 }
 0xb56   : > { %v1984_v25 = vpop.eup %1983  ;;  %1352 = vmatpush.msra.mxu0 %v1332_v24 }
 0xb57   : > { %v1302_v26 = vmul.f32 %v1984_v25, %v1976_v8  ;;  %1785 = vmatmul.msk.f32.vlgmr.msra.gmra.mxu3 %vm670_vm2, %v1304_v23  ;;  %v1287_v27 = vpop.xlane.xlu0 %1286  ;;  %1553 = vmatpush.msrb.mxu2 %v1804_v61  ;;  %v1946_v23 = vld [vmem:[%s2862_s8 + $0x1] ss:$0 sm:$0xff] }
 0xb58   : > { %1985 = vrcp.f32 %v1287_v27  ;;  %1517 = vmatpush.msrb.mxu0 %v1797_v56 }
 0xb59   : > { %1783 = vmatmul.msk.f32.vlgmr.msra.gmra.mxu0 %vm670_vm2, %v1302_v26  ;;  %1554 = vmatpush.msrb.mxu2 %v1803_v0 }
 0xb5b   : > { %1555 = vmatpush.msrb.mxu2 %v1802_v2 }
 0xb5d   : > { %1556 = vmatpush.msrb.mxu2 %v1801_v16 }
 0xb5e   : > { %v1986_v28 = vpop.eup %1985 }
 0xb5f   : > { %v1301_v29 = vmul.f32 %v1986_v28, %v1978_v12  ;;  %1557 = vmatpush.msrb.mxu2 %v1800_v17 }
 0xb61   : > { %1558 = vmatpush.msrb.mxu2 %v1799_v18 }
 0xb6a   : > { %v1306_v30 = vpop.permute.xlu0 %1305 }
 0xb6b   : > { %1326 = vmatpush.msra.mxu1 %v1306_v30 }
 0xb6c   : > { %1782 = vmatmul.msk.f32.vlgmr.msra.gmra.mxu1 %vm670_vm2, %v1301_v29 }
 0xb6d   : > { %1449 = vmatpush.msrb.mxu1 %v1789_v36 }
 0xb6f   : > { %1450 = vmatpush.msrb.mxu1 %v1788_v9 }
 0xb71   : > { %1451 = vmatpush.msrb.mxu1 %v1787_v37 }
 0xb73   : > { %1452 = vmatpush.msrb.mxu1 %v1786_v38 }
 0xbd5   : > { %v1380_v31 = vpop.f32.mrf.mxu2 }
 0xbd6   : > { %1414 = vrot.lane.b32.xlu2 %v1380_v31, %s2866_s13  ;;  %v1354_v33 = vpop.f32.mrf.mxu0  ;;  %s1612_s13 = sshll.u32 %s592_s24, 4  ;;  %s1613_s13 = int_to_ptr.vmem [resolvable:$true] %s1612_s13 }
 0xbd7   : > { %1410 = vrot.lane.b32.xlu1 %v1354_v33, %s2867_s2  ;;  %s1614_s2 = sshll.u32 %s1610_s26, 4  ;;  %s1615_s2 = int_to_ptr.hbm [resolvable:$true] %s1614_s2 }
 0xbda   : > { %v1406_v35 = vpop.f32.mrf.mxu3 }
 0xbdf   : > { %1418 = vrot.lane.b32.xlu1 %v1406_v35, %s2868_s10  ;;  %s2185_s10 = sshra.s32 %s1615_s2, 4  ;;  %s2186_s10 = int_to_ptr.hbm [resolvable:$true] %s2185_s10 }
 0xbe0   : > { %s2187_s0 = scalar_lea.hbm %s2186_s10, 8  ;;  %p2192_p12 = scmp.lt.s32.totalorder %s2186_s10, %s2869_s16 }
 0xbe1   : > { %p2188_p1 = scmp.ne.s32.totalorder %s2186_s10, %s2187_s0  ;;  %p2193_p8 = scmp.lt.s32.totalorder %s2191_s12, %s2187_s0 }
 0xbe3   : > { %p2189_p3 = pnand %p2188_p1, %p2435_p13  ;;  %p2194_p7 = por %p2193_p8, %p2192_p12 }
 0xbe5   : > { %p2190_p5 = pneg %p2189_p3 }
 0xbe7   : > { %p2195_p9 = pnand %p2194_p7, %p2190_p5 }
 0xbe9   : > { %v1328_v40 = vpop.f32.mrf.mxu1 }
 0xc30   : > { %v1415_v42 = vpop.permute.xlu2 %1414 }
 0xc49   : > { %v1411_v39 = vpop.permute.xlu1 %1410 }
 0xc4a   : > { %v1421_v41 = vsel %vm670_vm2, %v1328_v40, %v1411_v39 }
 0xc4b   : > { %v1422_v44 = vsel %vm597_vm0, %v1421_v41, %v1415_v42 }
 0xc51   : > { %v1419_v43 = vpop.permute.xlu1 %1418 }
 0xc52   : > { %v1423_v45 = vsel %vm935_vm3, %v1422_v44, %v1419_v43  ;;  %v1947_v43 = vld [vmem:[#allocation10 + $0x1] ss:$0 sm:$0xff] }
 0xc53   : > { %1791 = vmatmul.msk.f32.vlgmr.msrb.gmra.mxu1 %vm629_vm1, %v1423_v45  ;;  %v1948_v45 = vld [vmem:[#allocation11 + $0x1] ss:$0 sm:$0xff] }
 0xcd0   : > { %v1454_v47 = vpop.f32.mrf.mxu1 }
 0xcd1   : > { %v1455_v48 = vadd.f32 %v1942_v46, %v1454_v47 }
 0xcd3   : > { %v1457_v49 = vadd.f32 %v1455_v48, %v2645_v34  ;;  %v1796_v34 = vld [vmem:[%s2814_s7 + $0x30] sm:$0xff] }
 0xcd4   : > { %1518 = vmatpush.msrb.mxu0 %v1796_v34 }
 0xcd5   : > { %v1462_v50 = vsel %vm629_vm1, %v1457_v49, 0.0 }
 0xcd6   : > { %1463 = vadd.xlane.f32.xlu0 %v1462_v50  ;;  %1519 = vmatpush.msrb.mxu0 %v1795_v57 }
 0xcd8   : > { %1520 = vmatpush.msrb.mxu0 %v1794_v58 }
 0xd49   : > { %v1464_v51 = vpop.xlane.xlu0 %1463 }
 0xd4a   : > { %v1465_v52 = vmul.f32 %v1464_v51, %v2577_v32 }
 0xd4c   : > { %v1466_v53 = vsub.f32 %v1457_v49, %v1465_v52 }
 0xd4e   : > { %v1467_v54 = vmul.f32 %v1466_v53, %v1466_v53 }
 0xd50   : > { %v1468_v55 = vsel %vm629_vm1, %v1467_v54, 0.0 }
 0xd51   : > { %1469 = vadd.xlane.f32.xlu2 %v1468_v55 }
 0xdc4   : > { %v1470_v62 = vpop.xlane.xlu2 %1469 }
 0xdc5   : > { %v1471_v63 = vmul.f32 %v1470_v62, %v2577_v32 }
 0xdc7   : > { %v1472_v1 = vadd.f32 1e-05, %v1471_v63 }
 0xdc9   : > { %1987 = vrsqrt.f32 %v1472_v1  ;;  %vm1479_vm13 = vweird.f32 %v1472_v1 }
 0xdcf   : > { %v1988_v3 = vpop.eup %1987 }
 0xdd0   : > { %v1474_v4 = vmul.f32 %v1988_v3, %v1472_v1  ;;  %vm1480_vm12 = vweird.f32 %v1988_v3 }
 0xdd1   : > { %vm1481_vm14 = vmor %vm1479_vm13, %vm1480_vm12 }
 0xdd2   : > { %v1475_v5 = vmul.f32 %v1988_v3, %v1474_v4 }
 0xdd4   : > { %v1476_v6 = vmul.f32 0.5, %v1475_v5 }
 0xdd6   : > { %v1477_v7 = vsub.f32 1.5, %v1476_v6 }
 0xdd8   : > { %v1478_v8 = vmul.f32 %v1988_v3, %v1477_v7 }
 0xdda   : > { %v1482_v11 = vsel %vm1481_vm14, %v1988_v3, %v1478_v8 }
 0xddb   : > { %v1483_v12 = vmul.f32 %v1482_v11, %v1466_v53 }
 0xddd   : > { %v1487_v14 = vmul.f32 %v1943_v10, %v1483_v12 }
 0xddf   : > { %v1491_v15 = vadd.f32 %v1944_v13, %v1487_v14 }
 0xde1   : > { %1798 = vmatmul.msk.f32.vlgmr.msrb.gmra.mxu0 %vm629_vm1, %v1491_v15 }
 0xe5e   : > { %v1522_v20 = vpop.f32.mrf.mxu0 }
 0xe5f   : > { %v1523_v21 = vadd.f32 %v1945_v19, %v1522_v20 }
 0xe61   : > { %v1525_v22 = vmax.f32 %v1523_v21, 0.0 }
 0xe63   : > { %1808 = vmatmul.msk.f32.vlgmr.msrb.gmra.mxu2 %vm1052_vm8, %v1525_v22 }
 0xee6   : > { %v1560_v24 = vpop.f32.mrf.mxu2 }
 0xee7   : > { %v1561_v25 = vadd.f32 %v1946_v23, %v1560_v24 }
 0xee9   : > { %v1563_v26 = vadd.f32 %v1561_v25, %v1491_v15 }
 0xeeb   : > { %v1568_v27 = vsel %vm629_vm1, %v1563_v26, 0.0 }
 0xeec   : > { %1569 = vadd.xlane.f32.xlu1 %v1568_v27 }
 0xf5f   : > { %v1570_v28 = vpop.xlane.xlu1 %1569 }
 0xf60   : > { %v1571_v29 = vmul.f32 %v1570_v28, %v2577_v32 }
 0xf62   : > { %v1572_v30 = vsub.f32 %v1563_v26, %v1571_v29 }
 0xf64   : > { %v1573_v31 = vmul.f32 %v1572_v30, %v1572_v30 }
 0xf66   : > { %v1574_v33 = vsel %vm629_vm1, %v1573_v31, 0.0 }
 0xf67   : > { %1575 = vadd.xlane.f32.xlu0 %v1574_v33 }
 0xfda   : > { %v1576_v35 = vpop.xlane.xlu0 %1575 }
 0xfdb   : > { %v1577_v36 = vmul.f32 %v1576_v35, %v2577_v32 }
 0xfdd   : > { %v1578_v9 = vadd.f32 1e-05, %v1577_v36 }
 0xfdf   : > { %1989 = vrsqrt.f32 %v1578_v9  ;;  %vm1585_vm0 = vweird.f32 %v1578_v9 }
 0xfe5   : > { %v1990_v37 = vpop.eup %1989 }
 0xfe6   : > { %v1580_v38 = vmul.f32 %v1990_v37, %v1578_v9  ;;  %vm1586_vm15 = vweird.f32 %v1990_v37 }
 0xfe7   : > { %vm1587_vm2 = vmor %vm1585_vm0, %vm1586_vm15 }
 0xfe8   : > { %v1581_v39 = vmul.f32 %v1990_v37, %v1580_v38 }
 0xfea   : > { %v1582_v40 = vmul.f32 0.5, %v1581_v39 }
 0xfec   : > { %v1583_v41 = vsub.f32 1.5, %v1582_v40 }
 0xfee   : > { %v1584_v42 = vmul.f32 %v1990_v37, %v1583_v41 }
 0xff0   : > { %v1588_v32 = vsel %vm1587_vm2, %v1990_v37, %v1584_v42 }
 0xff1   : > { %v1589_v44 = vmul.f32 %v1588_v32, %v1572_v30 }
 0xff3   : > { %v1593_v46 = vmul.f32 %v1947_v43, %v1589_v44 }
 0xff5   : > { %v1597_v47 = vadd.f32 %v1948_v45, %v1593_v46 }
 0xff7   : > { %1598 = vst.msk [vmem:[%s592_s24] sm:$0xff] %vm629_vm1, %v1597_v47 }
 0xff8   : > { %2198 = shalt.err (!%p2195_p9)
}
 0xff9   : > { %1835 = dma.vmem_to_hbm [thread:$0]  (%p2435_p13), %s1613_s13, 128, %s1615_s2, %s1600_s25  }
 0xffa PF: > { %s1626_s29 = sand.u32 1, %s2237_s18   ;;  %p2871_p10 = scmp.ge.s32.totalorder %s2249_s21, 2 }
 0xffb   : > { %s1627_s24 = scalar_lea.sflag [#allocation4], %s1626_s29 }
 0xffc   : > { %p1858_p11 = pnand %p2871_p10, %p2440_p4 }
 0xffe   : > { %p1859_p0 = pneg %p1858_p11 }
0x1000   : > { %2232 = dma.done.wait (%p1859_p0), %s1627_s24, 128  }
0x1001   : > { %2234 = vsyncadd (%p1859_p0), %s1627_s24, 4294967168  ;;  %p31_p2 = scmp.ge.s32.totalorder %s2415_s23, 4   ;;  %s2872_s18 = smov %s2241_s19 }
0x1002   : > { %s2873_s19 = smov %s2245_s20  ;;  %s2874_s20 = smov %s2427_s22 }
0x1003   : > { %s2875_s21 = smov %s2415_s23  ;;  %33 = sbr.rel (!%p31_p2) target bundleno = 19 (0x13), region = 157 }
0x1008   :  { %1633 = vsyncpa [#allocation3], 1 }
0x1009   :  { %1635 = vsyncpa [#allocation3 + $0x1], 1 }
0x100a   :  { %1636 = vsyncpa [#allocation6], 1 }
0x100b   :  { %1637 = vsyncpa [#allocation9], 1 }
0x100c   :  { %1638 = vsyncpa [#allocation12], 1 }
0x100d   :  { %1639 = vsyncpa [#allocation4], 1 }
0x100e   :  { %1641 = vsyncpa [#allocation4 + $0x1], 1 }

</bundles_post_ra>
